<compile_context>
chip_gen: v7x
topology: tpu7x:2x2x1
jax: 0.10.0
libtpu: 0.0.40
codegen_flags: <defaults>
</compile_context>

<pallas_src>
import functools

import jax
import jax.numpy as jnp
from jax.experimental import pallas as pl
from jax.experimental.pallas import tpu as pltpu

_WEIGHTS = (0.32, 0.08, 0.02, 0.01, 0.005)


def _compiler_params(n_grid_axes):
    return pltpu.CompilerParams(
        dimension_semantics=("arbitrary",) * n_grid_axes,
        vmem_limit_bytes=32 * 1024 * 1024,
    )


def _pick_row_tile(h, cap):
    """Largest divisor of h that is a multiple of 8 and <= cap, else h (full block)."""
    if h <= cap:
        return h
    for d in range(cap, 7, -1):
        if h % d == 0 and d % 8 == 0:
            return d
    return h


def _pool_matrices(h_in, w_in, h_out, w_out):
    """0/1 (bf16-exact) matrices so that q @ x @ p sums the kh x kw pooling windows."""
    kh = h_in // h_out
    kw = w_in // w_out
    q = (jnp.arange(h_in)[None, :] // kh == jnp.arange(h_out)[:, None])
    p = (jnp.arange(w_in)[:, None] // kw == jnp.arange(w_out)[None, :])
    return q.astype(jnp.bfloat16), p.astype(jnp.bfloat16)


# ------------------------------- kernel helpers -------------------------------

def _split_bf16(x):
    hi = x.astype(jnp.bfloat16)
    lo = (x - hi.astype(jnp.float32)).astype(jnp.bfloat16)
    return hi, lo


def _pool_avg(x, q, p, inv_k):
    """Average-pool x [r_in, w_in] -> [r_out, w_out] on the MXU (~f32-exact)."""
    x_hi, x_lo = _split_bf16(x)
    y = (jnp.dot(q, x_hi, preferred_element_type=jnp.float32)
         + jnp.dot(q, x_lo, preferred_element_type=jnp.float32))
    y_hi, y_lo = _split_bf16(y)
    z = (jnp.dot(y_hi, p, preferred_element_type=jnp.float32)
         + jnp.dot(y_lo, p, preferred_element_type=jnp.float32))
    return z * inv_k


def _softplus(x):
    return jnp.maximum(x, 0.0) + jnp.log(1.0 + jnp.exp(-jnp.abs(x)))


# ------------------------------- training kernel -------------------------------

def _multi_level_loss_kernel(*refs, levels, div_flow):
    """Fused flow + occlusion loss over one or more pyramid levels (hierarchical pooling).

    refs: tflow, tocc, [pred_flow, pred_occ, q, p] * L, pooled_flow, pooled_occ, fsum, osum
    """
    n_lv = len(levels)
    tflow_ref, tocc_ref = refs[0], refs[1]
    lvl_refs = refs[2:2 + 4 * n_lv]
    pooled_f_ref, pooled_o_ref, fsum_ref, osum_ref = refs[2 + 4 * n_lv:]

    @pl.when((pl.program_id(0) == 0) & (pl.program_id(1) == 0))
    def _init():
        fsum_ref[...] = jnp.zeros_like(fsum_ref)
        osum_ref[...] = jnp.zeros_like(osum_ref)

    cur_u = tflow_ref[0, 0]
    cur_v = tflow_ref[0, 1]
    cur_o = tocc_ref[0]

    f_acc = jnp.float32(0.0)
    o_acc = jnp.float32(0.0)

    for lv, (inv_k, level_scale) in enumerate(levels):
        pf_ref, po_ref, q_ref, p_ref = lvl_refs[4 * lv:4 * lv + 4]
        q = q_ref[...]
        p = p_ref[...]
        cur_u = _pool_avg(cur_u, q, p, inv_k)   # adaptive_avg_pool2d (divisible case)
        cur_v = _pool_avg(cur_v, q, p, inv_k)
        cur_o = _pool_avg(cur_o, q, p, inv_k)

        # robust (Charbonnier) EPE: (|| div_flow*target - pred ||_2 + 0.01) ** 0.4
        du = div_flow * cur_u - pf_ref[0, 0]
        dv = div_flow * cur_v - pf_ref[0, 1]
        epe = jnp.sqrt(du * du + dv * dv)
        f_acc = f_acc + level_scale * jnp.sum(jnp.exp(0.4 * jnp.log(epe + 0.01)))

        # BCE(sigmoid(logits), pooled_target), reduction='sum', stable logits form.
        # TODO(synk): PyTorch BCELoss's -100 clamp after an f32 sigmoid that saturates
        # near |logit|~17 is only reproduced outside that saturation regime.
        logits = po_ref[0]
        sp_pos = _softplus(logits)          # == -log(1 - sigmoid(logits))
        sp_neg = sp_pos - logits            # == -log(sigmoid(logits))
        bce = (cur_o * jnp.minimum(sp_neg, 100.0)
               + (1.0 - cur_o) * jnp.minimum(sp_pos, 100.0))
        o_acc = o_acc + level_scale * jnp.sum(bce)

    # Emit the (un-div_flow-scaled) pooled target of the last level for the next call.
    pooled_f_ref[0, 0] = cur_u
    pooled_f_ref[0, 1] = cur_v
    pooled_o_ref[0] = cur_o

    fsum_ref[...] += f_acc
    osum_ref[...] += o_acc


def _multi_scale_loss_call(tflow, tocc, preds, *, level_scales, div_flow, row_tile_cap=32):
    """One fused pallas_call: hierarchical pooling + flow/occ losses for `preds` levels.

    tflow: [G, 2, H_in, W_in] raw target flow at the chain's input resolution.
    tocc:  [G, H_in, W_in]    raw target occlusion.
    preds: per level (pred_flow [G, 2, h, w], pred_occ_logits [G, h, w]).
    """
    g_count = int(tflow.shape[0])
    h_in, w_in = int(tflow.shape[-2]), int(tflow.shape[-1])
    n_lv = len(preds)

    h0_out, w0_out = int(preds[0][0].shape[-2]), int(preds[0][0].shape[-1])
    assert h_in % h0_out == 0 and w_in % w0_out == 0, (
        "TODO(synk): only the exactly-divisible adaptive_avg_pool2d case is implemented")

    # Row tiling is only used for a single-level call (the full-resolution scale).
    th_out0 = _pick_row_tile(h0_out, row_tile_cap) if n_lv == 1 else h0_out
    row_tiles = h0_out // th_out0
    th_in0 = th_out0 * (h_in // h0_out)

    in_arrays = [tflow, tocc]
    in_specs = [
        pl.BlockSpec((1, 2, th_in0, w_in), lambda g, i: (g, 0, i, 0)),
        pl.BlockSpec((1, th_in0, w_in), lambda g, i: (g, i, 0)),
    ]

    levels = []
    prev_h, prev_w, prev_th = h_in, w_in, th_in0
    for pf, po in preds:
        h_lv, w_lv = int(pf.shape[-2]), int(pf.shape[-1])
        assert prev_h % h_lv == 0 and prev_w % w_lv == 0, (
            "TODO(synk): only the exactly-divisible adaptive_avg_pool2d case is implemented")
        kh, kw = prev_h // h_lv, prev_w // w_lv
        th_lv = prev_th // kh
        q, p = _pool_matrices(prev_th, prev_w, th_lv, w_lv)
        in_arrays += [pf, po, q, p]
        in_specs += [
            pl.BlockSpec((1, 2, th_lv, w_lv), lambda g, i: (g, 0, i, 0)),
            pl.BlockSpec((1, th_lv, w_lv), lambda g, i: (g, i, 0)),
            pl.BlockSpec((th_lv, prev_th), lambda g, i: (0, 0)),
            pl.BlockSpec((prev_w, w_lv), lambda g, i: (0, 0)),
        ]
        levels.append((1.0 / float(kh * kw), float(level_scales[len(levels)])))
        prev_h, prev_w, prev_th = h_lv, w_lv, th_lv

    h_last, w_last, th_last = prev_h, prev_w, prev_th
    out_shape = [
        jax.ShapeDtypeStruct((g_count, 2, h_last, w_last), jnp.float32),
        jax.ShapeDtypeStruct((g_count, h_last, w_last), jnp.float32),
        jax.ShapeDtypeStruct((1, 128), jnp.float32),
        jax.ShapeDtypeStruct((1, 128), jnp.float32),
    ]
    out_specs = [
        pl.BlockSpec((1, 2, th_last, w_last), lambda g, i: (g, 0, i, 0)),
        pl.BlockSpec((1, th_last, w_last), lambda g, i: (g, i, 0)),
        pl.BlockSpec((1, 128), lambda g, i: (0, 0)),
        pl.BlockSpec((1, 128), lambda g, i: (0, 0)),
    ]

    kernel = functools.partial(_multi_level_loss_kernel,
                               levels=tuple(levels), div_flow=float(div_flow))
    pooled_f, pooled_o, fsum, osum = pl.pallas_call(
        kernel,
        grid=(g_count, row_tiles),
        in_specs=in_specs,
        out_specs=out_specs,
        out_shape=out_shape,
        compiler_params=_compiler_params(2),
    )(*in_arrays)
    return fsum[0, 0], osum[0, 0], pooled_f, pooled_o


# ------------------------------- training forward -------------------------------

def multi_scale_epe_pwc_occ_video_sintel_train(outputs_flo, outputs_occ,
                                               target_flows, target_occs,
                                               *, model_div_flow, batch_size):
    num_scales = len(outputs_flo)
    nframes = int(outputs_flo[0].shape[0])
    b = int(target_flows[0].shape[0])
    h_full, w_full = int(target_flows[0].shape[-2]), int(target_flows[0].shape[-1])

    level_scales = [_WEIGHTS[ii] / float(nframes) for ii in range(num_scales)]

    # ---- finest scale: one row-tiled call per frame, reading the raw targets ----
    h0, w0 = int(outputs_flo[0].shape[-2]), int(outputs_flo[0].shape[-1])
    flow_loss = jnp.float32(0.0)
    occ_loss = jnp.float32(0.0)
    pooled_f_frames = []
    pooled_o_frames = []
    for n in range(nframes):
        tflow = target_flows[n]                                   # [B, 2, H, W]
        tocc = target_occs[n].reshape(b, h_full, w_full)
        pf = outputs_flo[0][n]                                    # [B, 2, h0, w0]
        po = outputs_occ[0][n].reshape(b, h0, w0)
        fsum, osum, pfl, pocc = _multi_scale_loss_call(
            tflow, tocc, [(pf, po)],
            level_scales=level_scales[:1], div_flow=model_div_flow)
        flow_loss = flow_loss + fsum
        occ_loss = occ_loss + osum
        pooled_f_frames.append(pfl)
        pooled_o_frames.append(pocc)

    # ---- remaining (coarse) scales: a single fused call over all frames ----
    if num_scales > 1:
        ptf = jnp.concatenate(pooled_f_frames, axis=0)            # [N*B, 2, h0, w0]
        pto = jnp.concatenate(pooled_o_frames, axis=0)            # [N*B, h0, w0]
        preds = []
        for ii in range(1, num_scales):
            h_ii, w_ii = int(outputs_flo[ii].shape[-2]), int(outputs_flo[ii].shape[-1])
            preds.append((
                outputs_flo[ii].reshape(nframes * b, 2, h_ii, w_ii),
                outputs_occ[ii].reshape(nframes * b, h_ii, w_ii),
            ))
        fsum, osum, _, _ = _multi_scale_loss_call(
            ptf, pto, preds,
            level_scales=level_scales[1:], div_flow=model_div_flow)
        flow_loss = flow_loss + fsum
        occ_loss = occ_loss + osum

    f_loss = jax.lax.stop_gradient(flow_loss)                     # .detach()
    o_loss = jax.lax.stop_gradient(occ_loss)
    # NOTE: the reference's `(f_loss.data > o_loss.data).numpy` is a bound method
    # (always truthy), so the True branch is always taken: f_l_w = 1.
    f_l_w = 1.0
    o_l_w = f_loss / o_loss
    return {
        'flow_loss': flow_loss / batch_size,
        'occ_loss': occ_loss / batch_size,
        'total_loss': (flow_loss * f_l_w + occ_loss * o_l_w) / batch_size,
    }


# --------------------------------- eval forward ---------------------------------

def _eval_kernel(fp_ref, ft_ref, op_ref, ot_ref, epe_ref, tp_ref, pp_ref, tt_ref):
    @pl.when(pl.program_id(0) == 0)
    def _init():
        epe_ref[...] = jnp.zeros_like(epe_ref)

    du = ft_ref[0, 0] - fp_ref[0, 0]
    dv = ft_ref[0, 1] - fp_ref[0, 1]
    epe_ref[...] += jnp.sum(jnp.sqrt(du * du + dv * dv))

    yt = ot_ref[0]
    yp = (op_ref[0] > 0.0).astype(jnp.float32)    # == round(sigmoid(x)) for f32 logits
    ones = jnp.ones((1, 1, 128), jnp.float32)
    tp_ref[...] = ones * jnp.sum(yp * yt)
    pp_ref[...] = ones * jnp.sum(yp)
    tt_ref[...] = ones * jnp.sum(yt)


def multi_scale_epe_pwc_occ_video_sintel_eval(flow_pred, flow_tgt, occ_pred, occ_tgt):
    b, _, h, w = (int(s) for s in flow_pred.shape)
    occ_p = occ_pred.reshape(b, h, w)
    occ_t = occ_tgt.reshape(b, h, w).astype(jnp.float32)

    flow_spec = pl.BlockSpec((1, 2, h, w), lambda g: (g, 0, 0, 0))
    occ_spec = pl.BlockSpec((1, h, w), lambda g: (g, 0, 0))
    stat_spec = pl.BlockSpec((1, 1, 128), lambda g: (g, 0, 0))

    epe_sum, tp, pred_sum, true_sum = pl.pallas_call(
        _eval_kernel,
        grid=(b,),
        in_specs=[flow_spec, flow_spec, occ_spec, occ_spec],
        out_specs=[pl.BlockSpec((1, 128), lambda g: (0, 0)), stat_spec, stat_spec, stat_spec],
        out_shape=[
            jax.ShapeDtypeStruct((1, 128), jnp.float32),
            jax.ShapeDtypeStruct((b, 1, 128), jnp.float32),
            jax.ShapeDtypeStruct((b, 1, 128), jnp.float32),
            jax.ShapeDtypeStruct((b, 1, 128), jnp.float32),
        ],
        compiler_params=_compiler_params(1),
    )(flow_pred, flow_tgt, occ_p, occ_t)

    epe = epe_sum[0, 0] / float(b * 1 * h * w)       # .mean() of the [B,1,H,W] EPE map

    eps, beta2 = 1e-8, 1.0
    tp_b = tp[:, 0, 0]
    precision = tp_b / (pred_sum[:, 0, 0] + eps)
    recall = tp_b / (true_sum[:, 0, 0] + eps)
    f1 = jnp.mean(precision * recall / (precision * beta2 + recall + eps) * (1.0 + beta2))
    return {'epe': epe, 'F1': f1}


# ------------------------------------- demo -------------------------------------

if __name__ == "__main__":
    # hyper-params (the module has no learnable parameters)
    batch_size = 2
    model_div_flow = 0.05

    B, N = 2, 2                  # batch, number of frames
    H = W = 64                   # full-resolution target size
    scales = [(16, 16), (8, 8), (4, 4), (2, 2), (1, 1)]   # PWC pyramid

    key = jax.random.PRNGKey(0)
    keys = jax.random.split(key, 4 + 2 * len(scales) + 2)

    target_flows = [jax.random.normal(keys[0 + n], (B, 2, H, W), jnp.float32) * 5.0
                    for n in range(N)]
    target_occs = [(jax.random.uniform(keys[2 + n], (B, 1, H, W)) > 0.5).astype(jnp.float32)
                   for n in range(N)]
    outputs_flo = [jax.random.normal(keys[4 + s], (N, B, 2, h, w), jnp.float32)
                   for s, (h, w) in enumerate(scales)]
    outputs_occ = [jax.random.normal(keys[4 + len(scales) + s], (N, B, 1, h, w), jnp.float32)
                   for s, (h, w) in enumerate(scales)]

    # training-mode forward (nn.Module default state)
    train_losses = multi_scale_epe_pwc_occ_video_sintel_train(
        outputs_flo, outputs_occ, target_flows, target_occs,
        model_div_flow=model_div_flow, batch_size=batch_size)
    jax.block_until_ready(train_losses)

    # eval-mode forward (last-frame, full-resolution predictions)
    flow_pred = jax.random.normal(keys[-2], (B, 2, H, W), jnp.float32) * 5.0
    occ_pred = jax.random.normal(keys[-1], (B, 1, H, W), jnp.float32)
    eval_metrics = multi_scale_epe_pwc_occ_video_sintel_eval(
        flow_pred, target_flows[-1], occ_pred, target_occs[-1])
    jax.block_until_ready(eval_metrics)

    print("KERNEL_OK")
</pallas_src>

<mosaic_0001>
module attributes {stable_mosaic.version = 11 : i64} {
  func.func @_multi_level_loss_kernel(%arg0: i32, %arg1: i32, %arg2: memref<1x2x64x64xf32, #tpu.memory_space<vmem>>, %arg3: memref<1x64x64xf32, #tpu.memory_space<vmem>>, %arg4: memref<1x2x16x16xf32, #tpu.memory_space<vmem>>, %arg5: memref<1x16x16xf32, #tpu.memory_space<vmem>>, %arg6: memref<16x64xbf16, #tpu.memory_space<vmem>>, %arg7: memref<64x16xbf16, #tpu.memory_space<vmem>>, %arg8: memref<1x2x16x16xf32, #tpu.memory_space<vmem>>, %arg9: memref<1x16x16xf32, #tpu.memory_space<vmem>>, %arg10: memref<1x128xf32, #tpu.memory_space<vmem>>, %arg11: memref<1x128xf32, #tpu.memory_space<vmem>>) attributes {dimension_semantics = [#tpu.dimension_semantics<arbitrary>, #tpu.dimension_semantics<arbitrary>], iteration_bounds = array<i64: 2, 1>, scalar_prefetch = 0 : i64, scratch_operands = 0 : i64, tpu.core_type = #tpu.core_type<tc>, window_params = [{transform_indices = @transform_0, window_bounds = array<i64: 1, 2, 64, 64>}, {transform_indices = @transform_1, window_bounds = array<i64: 1, 64, 64>}, {transform_indices = @transform_2, window_bounds = array<i64: 1, 2, 16, 16>}, {transform_indices = @transform_3, window_bounds = array<i64: 1, 16, 16>}, {pipeline_mode = #tpu.pipeline_mode<synchronous>, transform_indices = @transform_4, window_bounds = array<i64: 16, 64>}, {pipeline_mode = #tpu.pipeline_mode<synchronous>, transform_indices = @transform_5, window_bounds = array<i64: 64, 16>}, {transform_indices = @transform_6, window_bounds = array<i64: 1, 2, 16, 16>}, {transform_indices = @transform_7, window_bounds = array<i64: 1, 16, 16>}, {pipeline_mode = #tpu.pipeline_mode<synchronous>, transform_indices = @transform_8, window_bounds = array<i64: 1, 128>}, {pipeline_mode = #tpu.pipeline_mode<synchronous>, transform_indices = @transform_9, window_bounds = array<i64: 1, 128>}]} {
    %c0_i32 = arith.constant 0 : i32
    %0 = arith.cmpi eq, %arg0, %c0_i32 : i32
    %c0_i32_0 = arith.constant 0 : i32
    %1 = arith.cmpi eq, %arg1, %c0_i32_0 : i32
    %2 = arith.andi %0, %1 : i1
    %3 = arith.extui %2 : i1 to i32
    %c0_i32_1 = arith.constant 0 : i32
    %4 = arith.cmpi ne, %3, %c0_i32_1 : i32
    scf.if %4 {
      %cst_75 = arith.constant 0.000000e+00 : f32
      %132 = vector.broadcast %cst_75 : f32 to vector<1x128xf32>
      %c0_76 = arith.constant 0 : index
      %c0_77 = arith.constant 0 : index
      %133 = vector.load %arg10[%c0_76, %c0_77] : memref<1x128xf32, #tpu.memory_space<vmem>>, vector<1x128xf32>
      tpu.vector_store %arg10[%c0_76, %c0_77], %132 {strides = array<i32>} : memref<1x128xf32, #tpu.memory_space<vmem>>, vector<1x128xf32>,
      %cst_78 = arith.constant 0.000000e+00 : f32
      %134 = vector.broadcast %cst_78 : f32 to vector<1x128xf32>
      %c0_79 = arith.constant 0 : index
      %c0_80 = arith.constant 0 : index
      %135 = vector.load %arg11[%c0_79, %c0_80] : memref<1x128xf32, #tpu.memory_space<vmem>>, vector<1x128xf32>
      tpu.vector_store %arg11[%c0_79, %c0_80], %134 {strides = array<i32>} : memref<1x128xf32, #tpu.memory_space<vmem>>, vector<1x128xf32>,
    } else {
    }
    %c0 = arith.constant 0 : index
    %c0_2 = arith.constant 0 : index
    %c0_3 = arith.constant 0 : index
    %c0_4 = arith.constant 0 : index
    %5 = vector.load %arg2[%c0, %c0_2, %c0_3, %c0_4] : memref<1x2x64x64xf32, #tpu.memory_space<vmem>>, vector<1x1x64x64xf32>
    %6 = vector.shape_cast %5 : vector<1x1x64x64xf32> to vector<64x64xf32>
    %c0_5 = arith.constant 0 : index
    %c1 = arith.constant 1 : index
    %c0_6 = arith.constant 0 : index
    %c0_7 = arith.constant 0 : index
    %7 = vector.load %arg2[%c0_5, %c1, %c0_6, %c0_7] : memref<1x2x64x64xf32, #tpu.memory_space<vmem>>, vector<1x1x64x64xf32>
    %8 = vector.shape_cast %7 : vector<1x1x64x64xf32> to vector<64x64xf32>
    %c0_8 = arith.constant 0 : index
    %c0_9 = arith.constant 0 : index
    %c0_10 = arith.constant 0 : index
    %9 = vector.load %arg3[%c0_8, %c0_9, %c0_10] : memref<1x64x64xf32, #tpu.memory_space<vmem>>, vector<1x64x64xf32>
    %10 = vector.shape_cast %9 : vector<1x64x64xf32> to vector<64x64xf32>
    %c0_11 = arith.constant 0 : index
    %c0_12 = arith.constant 0 : index
    %11 = vector.load %arg6[%c0_11, %c0_12] : memref<16x64xbf16, #tpu.memory_space<vmem>>, vector<16x64xbf16>
    %c0_13 = arith.constant 0 : index
    %c0_14 = arith.constant 0 : index
    %12 = vector.load %arg7[%c0_13, %c0_14] : memref<64x16xbf16, #tpu.memory_space<vmem>>, vector<64x16xbf16>
    %13 = arith.truncf %6 : vector<64x64xf32> to vector<64x64xbf16>
    %14 = arith.extf %13 : vector<64x64xbf16> to vector<64x64xf32>
    %15 = arith.subf %6, %14 : vector<64x64xf32>
    %16 = arith.truncf %15 : vector<64x64xf32> to vector<64x64xbf16>
    %cst = arith.constant dense<0.000000e+00> : vector<16x64xf32>
    %17 = tpu.matmul %11, %13, %cst {dimension_numbers = #tpu.dot_dimension_numbers<[1], [0], [0], [1], [0, 0, 1, 1], [], []>} : vector<16x64xbf16>, vector<64x64xbf16>, vector<16x64xf32> -> vector<16x64xf32>
    %cst_15 = arith.constant dense<0.000000e+00> : vector<16x64xf32>
    %18 = tpu.matmul %11, %16, %cst_15 {dimension_numbers = #tpu.dot_dimension_numbers<[1], [0], [0], [1], [0, 0, 1, 1], [], []>} : vector<16x64xbf16>, vector<64x64xbf16>, vector<16x64xf32> -> vector<16x64xf32>
    %19 = arith.addf %17, %18 : vector<16x64xf32>
    %20 = arith.truncf %19 : vector<16x64xf32> to vector<16x64xbf16>
    %21 = arith.extf %20 : vector<16x64xbf16> to vector<16x64xf32>
    %22 = arith.subf %19, %21 : vector<16x64xf32>
    %23 = arith.truncf %22 : vector<16x64xf32> to vector<16x64xbf16>
    %cst_16 = arith.constant dense<0.000000e+00> : vector<16x16xf32>
    %24 = tpu.matmul %20, %12, %cst_16 {dimension_numbers = #tpu.dot_dimension_numbers<[1], [0], [0], [1], [0, 0, 1, 1], [], []>} : vector<16x64xbf16>, vector<64x16xbf16>, vector<16x16xf32> -> vector<16x16xf32>
    %cst_17 = arith.constant dense<0.000000e+00> : vector<16x16xf32>
    %25 = tpu.matmul %23, %12, %cst_17 {dimension_numbers = #tpu.dot_dimension_numbers<[1], [0], [0], [1], [0, 0, 1, 1], [], []>} : vector<16x64xbf16>, vector<64x16xbf16>, vector<16x16xf32> -> vector<16x16xf32>
    %26 = arith.addf %24, %25 : vector<16x16xf32>
    %cst_18 = arith.constant 6.250000e-02 : f32
    %27 = vector.broadcast %cst_18 : f32 to vector<16x16xf32>
    %28 = arith.mulf %26, %27 : vector<16x16xf32>
    %29 = arith.truncf %8 : vector<64x64xf32> to vector<64x64xbf16>
    %30 = arith.extf %29 : vector<64x64xbf16> to vector<64x64xf32>
    %31 = arith.subf %8, %30 : vector<64x64xf32>
    %32 = arith.truncf %31 : vector<64x64xf32> to vector<64x64xbf16>
    %cst_19 = arith.constant dense<0.000000e+00> : vector<16x64xf32>
    %33 = tpu.matmul %11, %29, %cst_19 {dimension_numbers = #tpu.dot_dimension_numbers<[1], [0], [0], [1], [0, 0, 1, 1], [], []>} : vector<16x64xbf16>, vector<64x64xbf16>, vector<16x64xf32> -> vector<16x64xf32>
    %cst_20 = arith.constant dense<0.000000e+00> : vector<16x64xf32>
    %34 = tpu.matmul %11, %32, %cst_20 {dimension_numbers = #tpu.dot_dimension_numbers<[1], [0], [0], [1], [0, 0, 1, 1], [], []>} : vector<16x64xbf16>, vector<64x64xbf16>, vector<16x64xf32> -> vector<16x64xf32>
    %35 = arith.addf %33, %34 : vector<16x64xf32>
    %36 = arith.truncf %35 : vector<16x64xf32> to vector<16x64xbf16>
    %37 = arith.extf %36 : vector<16x64xbf16> to vector<16x64xf32>
    %38 = arith.subf %35, %37 : vector<16x64xf32>
    %39 = arith.truncf %38 : vector<16x64xf32> to vector<16x64xbf16>
    %cst_21 = arith.constant dense<0.000000e+00> : vector<16x16xf32>
    %40 = tpu.matmul %36, %12, %cst_21 {dimension_numbers = #tpu.dot_dimension_numbers<[1], [0], [0], [1], [0, 0, 1, 1], [], []>} : vector<16x64xbf16>, vector<64x16xbf16>, vector<16x16xf32> -> vector<16x16xf32>
    %cst_22 = arith.constant dense<0.000000e+00> : vector<16x16xf32>
    %41 = tpu.matmul %39, %12, %cst_22 {dimension_numbers = #tpu.dot_dimension_numbers<[1], [0], [0], [1], [0, 0, 1, 1], [], []>} : vector<16x64xbf16>, vector<64x16xbf16>, vector<16x16xf32> -> vector<16x16xf32>
    %42 = arith.addf %40, %41 : vector<16x16xf32>
    %cst_23 = arith.constant 6.250000e-02 : f32
    %43 = vector.broadcast %cst_23 : f32 to vector<16x16xf32>
    %44 = arith.mulf %42, %43 : vector<16x16xf32>
    %45 = arith.truncf %10 : vector<64x64xf32> to vector<64x64xbf16>
    %46 = arith.extf %45 : vector<64x64xbf16> to vector<64x64xf32>
    %47 = arith.subf %10, %46 : vector<64x64xf32>
    %48 = arith.truncf %47 : vector<64x64xf32> to vector<64x64xbf16>
    %cst_24 = arith.constant dense<0.000000e+00> : vector<16x64xf32>
    %49 = tpu.matmul %11, %45, %cst_24 {dimension_numbers = #tpu.dot_dimension_numbers<[1], [0], [0], [1], [0, 0, 1, 1], [], []>} : vector<16x64xbf16>, vector<64x64xbf16>, vector<16x64xf32> -> vector<16x64xf32>
    %cst_25 = arith.constant dense<0.000000e+00> : vector<16x64xf32>
    %50 = tpu.matmul %11, %48, %cst_25 {dimension_numbers = #tpu.dot_dimension_numbers<[1], [0], [0], [1], [0, 0, 1, 1], [], []>} : vector<16x64xbf16>, vector<64x64xbf16>, vector<16x64xf32> -> vector<16x64xf32>
    %51 = arith.addf %49, %50 : vector<16x64xf32>
    %52 = arith.truncf %51 : vector<16x64xf32> to vector<16x64xbf16>
    %53 = arith.extf %52 : vector<16x64xbf16> to vector<16x64xf32>
    %54 = arith.subf %51, %53 : vector<16x64xf32>
    %55 = arith.truncf %54 : vector<16x64xf32> to vector<16x64xbf16>
    %cst_26 = arith.constant dense<0.000000e+00> : vector<16x16xf32>
    %56 = tpu.matmul %52, %12, %cst_26 {dimension_numbers = #tpu.dot_dimension_numbers<[1], [0], [0], [1], [0, 0, 1, 1], [], []>} : vector<16x64xbf16>, vector<64x16xbf16>, vector<16x16xf32> -> vector<16x16xf32>
    %cst_27 = arith.constant dense<0.000000e+00> : vector<16x16xf32>
    %57 = tpu.matmul %55, %12, %cst_27 {dimension_numbers = #tpu.dot_dimension_numbers<[1], [0], [0], [1], [0, 0, 1, 1], [], []>} : vector<16x64xbf16>, vector<64x16xbf16>, vector<16x16xf32> -> vector<16x16xf32>
    %58 = arith.addf %56, %57 : vector<16x16xf32>
    %cst_28 = arith.constant 6.250000e-02 : f32
    %59 = vector.broadcast %cst_28 : f32 to vector<16x16xf32>
    %60 = arith.mulf %58, %59 : vector<16x16xf32>
    %cst_29 = arith.constant 5.000000e-02 : f32
    %61 = vector.broadcast %cst_29 : f32 to vector<16x16xf32>
    %62 = arith.mulf %61, %28 : vector<16x16xf32>
    %c0_30 = arith.constant 0 : index
    %c0_31 = arith.constant 0 : index
    %c0_32 = arith.constant 0 : index
    %c0_33 = arith.constant 0 : index
    %63 = vector.load %arg4[%c0_30, %c0_31, %c0_32, %c0_33] : memref<1x2x16x16xf32, #tpu.memory_space<vmem>>, vector<1x1x16x16xf32>
    %64 = vector.shape_cast %63 : vector<1x1x16x16xf32> to vector<16x16xf32>
    %65 = arith.subf %62, %64 : vector<16x16xf32>
    %cst_34 = arith.constant 5.000000e-02 : f32
    %66 = vector.broadcast %cst_34 : f32 to vector<16x16xf32>
    %67 = arith.mulf %66, %44 : vector<16x16xf32>
    %c0_35 = arith.constant 0 : index
    %c1_36 = arith.constant 1 : index
    %c0_37 = arith.constant 0 : index
    %c0_38 = arith.constant 0 : index
    %68 = vector.load %arg4[%c0_35, %c1_36, %c0_37, %c0_38] : memref<1x2x16x16xf32, #tpu.memory_space<vmem>>, vector<1x1x16x16xf32>
    %69 = vector.shape_cast %68 : vector<1x1x16x16xf32> to vector<16x16xf32>
    %70 = arith.subf %67, %69 : vector<16x16xf32>
    %71 = arith.mulf %65, %65 : vector<16x16xf32>
    %72 = arith.mulf %70, %70 : vector<16x16xf32>
    %73 = arith.addf %71, %72 : vector<16x16xf32>
    %74 = math.sqrt %73 : vector<16x16xf32>
    %cst_39 = arith.constant 0.00999999977 : f32
    %75 = vector.broadcast %cst_39 : f32 to vector<16x16xf32>
    %76 = arith.addf %74, %75 : vector<16x16xf32>
    %77 = math.log %76 : vector<16x16xf32>
    %cst_40 = arith.constant 4.000000e-01 : f32
    %78 = vector.broadcast %cst_40 : f32 to vector<16x16xf32>
    %79 = arith.mulf %78, %77 : vector<16x16xf32>
    %80 = math.exp %79 : vector<16x16xf32>
    %81 = vector.shape_cast %80 : vector<16x16xf32> to vector<1x16x16xf32>
    %cst_41 = arith.constant dense<0.000000e+00> : vector<1xf32>
    %82 = vector.multi_reduction <add>, %81, %cst_41 [1, 2] : vector<1x16x16xf32> to vector<1xf32>
    %83 = vector.shape_cast %82 : vector<1xf32> to vector<1x1x1xf32>
    %84 = vector.extract %83[0, 0, 0] : f32 from vector<1x1x1xf32>
    %cst_42 = arith.constant 1.600000e-01 : f32
    %85 = arith.mulf %cst_42, %84 : f32
    %cst_43 = arith.constant 0.000000e+00 : f32
    %86 = arith.addf %cst_43, %85 : f32
    %c0_44 = arith.constant 0 : index
    %c0_45 = arith.constant 0 : index
    %c0_46 = arith.constant 0 : index
    %87 = vector.load %arg5[%c0_44, %c0_45, %c0_46] : memref<1x16x16xf32, #tpu.memory_space<vmem>>, vector<1x16x16xf32>
    %88 = vector.shape_cast %87 : vector<1x16x16xf32> to vector<16x16xf32>
    %cst_47 = arith.constant 0.000000e+00 : f32
    %89 = vector.broadcast %cst_47 : f32 to vector<16x16xf32>
    %90 = arith.maximumf %88, %89 : vector<16x16xf32>
    %91 = math.absf %88 : vector<16x16xf32>
    %cst_48 = arith.constant 0.000000e+00 : f32
    %92 = vector.broadcast %cst_48 : f32 to vector<16x16xf32>
    %93 = arith.subf %92, %91 : vector<16x16xf32>
    %94 = math.exp %93 : vector<16x16xf32>
    %cst_49 = arith.constant 1.000000e+00 : f32
    %95 = vector.broadcast %cst_49 : f32 to vector<16x16xf32>
    %96 = arith.addf %95, %94 : vector<16x16xf32>
    %97 = math.log %96 : vector<16x16xf32>
    %98 = arith.addf %90, %97 : vector<16x16xf32>
    %99 = arith.subf %98, %88 : vector<16x16xf32>
    %cst_50 = arith.constant 1.000000e+02 : f32
    %100 = vector.broadcast %cst_50 : f32 to vector<16x16xf32>
    %101 = arith.minimumf %99, %100 : vector<16x16xf32>
    %102 = arith.mulf %60, %101 : vector<16x16xf32>
    %cst_51 = arith.constant 1.000000e+00 : f32
    %103 = vector.broadcast %cst_51 : f32 to vector<16x16xf32>
    %104 = arith.subf %103, %60 : vector<16x16xf32>
    %cst_52 = arith.constant 1.000000e+02 : f32
    %105 = vector.broadcast %cst_52 : f32 to vector<16x16xf32>
    %106 = arith.minimumf %98, %105 : vector<16x16xf32>
    %107 = arith.mulf %104, %106 : vector<16x16xf32>
    %108 = arith.addf %102, %107 : vector<16x16xf32>
    %109 = vector.shape_cast %108 : vector<16x16xf32> to vector<1x16x16xf32>
    %cst_53 = arith.constant dense<0.000000e+00> : vector<1xf32>
    %110 = vector.multi_reduction <add>, %109, %cst_53 [1, 2] : vector<1x16x16xf32> to vector<1xf32>
    %111 = vector.shape_cast %110 : vector<1xf32> to vector<1x1x1xf32>
    %112 = vector.extract %111[0, 0, 0] : f32 from vector<1x1x1xf32>
    %cst_54 = arith.constant 1.600000e-01 : f32
    %113 = arith.mulf %cst_54, %112 : f32
    %cst_55 = arith.constant 0.000000e+00 : f32
    %114 = arith.addf %cst_55, %113 : f32
    %c0_56 = arith.constant 0 : index
    %c0_57 = arith.constant 0 : index
    %c0_58 = arith.constant 0 : index
    %c0_59 = arith.constant 0 : index
    %115 = vector.load %arg8[%c0_56, %c0_57, %c0_58, %c0_59] : memref<1x2x16x16xf32, #tpu.memory_space<vmem>>, vector<1x1x16x16xf32>
    %116 = vector.shape_cast %115 : vector<1x1x16x16xf32> to vector<16x16xf32>
    %117 = vector.shape_cast %28 : vector<16x16xf32> to vector<1x1x16x16xf32>
    tpu.vector_store %arg8[%c0_56, %c0_57, %c0_58, %c0_59], %117 {strides = array<i32>} : memref<1x2x16x16xf32, #tpu.memory_space<vmem>>, vector<1x1x16x16xf32>,
    %c0_60 = arith.constant 0 : index
    %c1_61 = arith.constant 1 : index
    %c0_62 = arith.constant 0 : index
    %c0_63 = arith.constant 0 : index
    %118 = vector.load %arg8[%c0_60, %c1_61, %c0_62, %c0_63] : memref<1x2x16x16xf32, #tpu.memory_space<vmem>>, vector<1x1x16x16xf32>
    %119 = vector.shape_cast %118 : vector<1x1x16x16xf32> to vector<16x16xf32>
    %120 = vector.shape_cast %44 : vector<16x16xf32> to vector<1x1x16x16xf32>
    tpu.vector_store %arg8[%c0_60, %c1_61, %c0_62, %c0_63], %120 {strides = array<i32>} : memref<1x2x16x16xf32, #tpu.memory_space<vmem>>, vector<1x1x16x16xf32>,
    %c0_64 = arith.constant 0 : index
    %c0_65 = arith.constant 0 : index
    %c0_66 = arith.constant 0 : index
    %121 = vector.load %arg9[%c0_64, %c0_65, %c0_66] : memref<1x16x16xf32, #tpu.memory_space<vmem>>, vector<1x16x16xf32>
    %122 = vector.shape_cast %121 : vector<1x16x16xf32> to vector<16x16xf32>
    %123 = vector.shape_cast %60 : vector<16x16xf32> to vector<1x16x16xf32>
    tpu.vector_store %arg9[%c0_64, %c0_65, %c0_66], %123 {strides = array<i32>} : memref<1x16x16xf32, #tpu.memory_space<vmem>>, vector<1x16x16xf32>,
    %c0_67 = arith.constant 0 : index
    %c0_68 = arith.constant 0 : index
    %124 = vector.load %arg10[%c0_67, %c0_68] : memref<1x128xf32, #tpu.memory_space<vmem>>, vector<1x128xf32>
    %125 = vector.broadcast %86 : f32 to vector<1x128xf32>
    %126 = arith.addf %124, %125 : vector<1x128xf32>
    %c0_69 = arith.constant 0 : index
    %c0_70 = arith.constant 0 : index
    %127 = vector.load %arg10[%c0_69, %c0_70] : memref<1x128xf32, #tpu.memory_space<vmem>>, vector<1x128xf32>
    tpu.vector_store %arg10[%c0_69, %c0_70], %126 {strides = array<i32>} : memref<1x128xf32, #tpu.memory_space<vmem>>, vector<1x128xf32>,
    %c0_71 = arith.constant 0 : index
    %c0_72 = arith.constant 0 : index
    %128 = vector.load %arg11[%c0_71, %c0_72] : memref<1x128xf32, #tpu.memory_space<vmem>>, vector<1x128xf32>
    %129 = vector.broadcast %114 : f32 to vector<1x128xf32>
    %130 = arith.addf %128, %129 : vector<1x128xf32>
    %c0_73 = arith.constant 0 : index
    %c0_74 = arith.constant 0 : index
    %131 = vector.load %arg11[%c0_73, %c0_74] : memref<1x128xf32, #tpu.memory_space<vmem>>, vector<1x128xf32>
    tpu.vector_store %arg11[%c0_73, %c0_74], %130 {strides = array<i32>} : memref<1x128xf32, #tpu.memory_space<vmem>>, vector<1x128xf32>,
    return
  }
  func.func @transform_0(%arg0: i32, %arg1: i32) -> (i32, i32, i32, i32) {
    %c0_i32 = arith.constant 0 : i32
    %c0_i32_0 = arith.constant 0 : i32
    %c0_i32_1 = arith.constant 0 : i32
    return %arg0, %c0_i32, %arg1, %c0_i32_0 : i32, i32, i32, i32
  }
  func.func @transform_1(%arg0: i32, %arg1: i32) -> (i32, i32, i32) {
    %c0_i32 = arith.constant 0 : i32
    %c0_i32_0 = arith.constant 0 : i32
    return %arg0, %arg1, %c0_i32 : i32, i32, i32
  }
  func.func @transform_2(%arg0: i32, %arg1: i32) -> (i32, i32, i32, i32) {
    %c0_i32 = arith.constant 0 : i32
    %c0_i32_0 = arith.constant 0 : i32
    %c0_i32_1 = arith.constant 0 : i32
    return %arg0, %c0_i32, %arg1, %c0_i32_0 : i32, i32, i32, i32
  }
  func.func @transform_3(%arg0: i32, %arg1: i32) -> (i32, i32, i32) {
    %c0_i32 = arith.constant 0 : i32
    %c0_i32_0 = arith.constant 0 : i32
    return %arg0, %arg1, %c0_i32 : i32, i32, i32
  }
  func.func @transform_4(%arg0: i32, %arg1: i32) -> (i32, i32) {
    %c0_i32 = arith.constant 0 : i32
    %c0_i32_0 = arith.constant 0 : i32
    %c0_i32_1 = arith.constant 0 : i32
    return %c0_i32, %c0_i32_0 : i32, i32
  }
  func.func @transform_5(%arg0: i32, %arg1: i32) -> (i32, i32) {
    %c0_i32 = arith.constant 0 : i32
    %c0_i32_0 = arith.constant 0 : i32
    %c0_i32_1 = arith.constant 0 : i32
    return %c0_i32, %c0_i32_0 : i32, i32
  }
  func.func @transform_6(%arg0: i32, %arg1: i32) -> (i32, i32, i32, i32) {
    %c0_i32 = arith.constant 0 : i32
    %c0_i32_0 = arith.constant 0 : i32
    %c0_i32_1 = arith.constant 0 : i32
    return %arg0, %c0_i32, %arg1, %c0_i32_0 : i32, i32, i32, i32
  }
  func.func @transform_7(%arg0: i32, %arg1: i32) -> (i32, i32, i32) {
    %c0_i32 = arith.constant 0 : i32
    %c0_i32_0 = arith.constant 0 : i32
    return %arg0, %arg1, %c0_i32 : i32, i32, i32
  }
  func.func @transform_8(%arg0: i32, %arg1: i32) -> (i32, i32) {
    %c0_i32 = arith.constant 0 : i32
    %c0_i32_0 = arith.constant 0 : i32
    %c0_i32_1 = arith.constant 0 : i32
    return %c0_i32, %c0_i32_0 : i32, i32
  }
  func.func @transform_9(%arg0: i32, %arg1: i32) -> (i32, i32) {
    %c0_i32 = arith.constant 0 : i32
    %c0_i32_0 = arith.constant 0 : i32
    %c0_i32_1 = arith.constant 0 : i32
    return %c0_i32, %c0_i32_0 : i32, i32
  }
}

</mosaic_0001>

<bundles_post_ra>
// kernel: tpu_custom_call.1
= control target key start
LH: loop header
LB: loop body
LE: loop exit
PB: predicated region body
PF: predicated region fallthrough
CT: control target
= control target key end

     0   :  { %s2918_s0 = inlined_call_operand.hbm [shape: f32[2,2,64,64], index: 0, kind: input, shape index: {}]   ;;  %s2919_s1 = inlined_call_operand.hbm [shape: f32[2,64,64], index: 1, kind: input, shape index: {}]   ;;  %s2920_s2 = inlined_call_operand.hbm [shape: f32[2,2,16,16], index: 2, kind: input, shape index: {}]   ;;  %s2921_s3 = inlined_call_operand.vmem [shape: f32[2,16,16], index: 3, kind: input, shape index: {}]   ;;  %s2922_s4 = inlined_call_operand.vmem [shape: bf16[16,64], index: 4, kind: input, shape index: {}]   ;;  %s2923_s5 = inlined_call_operand.vmem [shape: bf16[64,16], index: 5, kind: input, shape index: {}]   ;;  %s2924_s6 = inlined_call_operand.hbm [shape: f32[2,2,16,16], index: 6, kind: output, shape index: {0}]   ;;  %s2925_s7 = inlined_call_operand.hbm [shape: f32[2,16,16], index: 7, kind: output, shape index: {1}]   ;;  %s2926_s8 = inlined_call_operand.hbm [shape: f32[1,128], index: 8, kind: output, shape index: {2}]   ;;  %s2927_s9 = inlined_call_operand.hbm [shape: f32[1,128], index: 9, kind: output, shape index: {3}]  }
   0x1   :  { %2943 = sst [smem:[#allocation26_spill]] %s2918_s0 }
   0x2   :  { %2944 = sst [smem:[#allocation27_spill]] %s2919_s1 }
   0x3   :  { %2945 = sst [smem:[#allocation28_spill]] %s2927_s9 }
   0x4   :  { %15 = vsyncpa [#allocation3], 0 }
   0x5   :  { %17 = vsyncpa [#allocation3 + $0x1], 0 }
   0x6   :  { %18 = vsyncpa [#allocation6], 0 }
   0x7   :  { %20 = vsyncpa [#allocation6 + $0x1], 0 }
   0x8   :  { %21 = vsyncpa [#allocation4], 0 }
   0x9   :  { %23 = vsyncpa [#allocation4 + $0x1], 0 }
   0xa   :  { %24 = vsyncpa [#allocation10], 0 }
   0xb   :  { %26 = vsyncpa [#allocation10 + $0x1], 0 }
   0xc   :  { %27 = vsyncpa [#allocation13], 0  ;;  %s2339_s30 = smov 0   ;;  %s2341_s10 = smov 0  }
   0xd   :  { %s2343_s11 = smov 0   ;;  %s2345_s12 = smov 0  }
   0xe   :  { %s2347_s13 = smov 0   ;;  %s2349_s14 = smov 0  }
   0xf LB: > { %2946 = sst [smem:[#allocation20_spill]] %s2253_s30  ;;  %s2370_s15 = sadd.s32 4294967295, %s2273_s14   ;;  %s2273_s14 = sphi %s2349_s14, %s33_s14   ;;  %s2269_s13 = sphi %s2347_s13, %s2989_s13   ;;  %s2265_s12 = sphi %s2345_s12, %s2988_s12   ;;  %s2261_s11 = sphi %s2343_s11, %s2984_s11   ;;  %s2257_s10 = sphi %s2341_s10, %s2987_s10   ;;  %s2253_s30 = sphi %s2339_s30, %s2986_s30  }
  0x10   : > { %2947 = sst [smem:[#allocation21_spill]] %s2261_s11  ;;  %s2928_s16 = sadd.s32 4294967294, %s2273_s14  }
  0x11   : > { %2948 = sst [smem:[#allocation22_spill]] %s2273_s14  ;;  %s45_s17 = sadd.s32 1, %s2269_s13 }
  0x12   : > { %s54_s18 = sadd.s32 1, %s2261_s11  ;;  %p47_p0 = scmp.ge.s32.totalorder %s45_s17, 2 }
  0x13   : > { %p61_p1 = scmp.ne.s32.totalorder %s2261_s11, %s2257_s10  ;;  %p62_p2 = scmp.eq.s32.totalorder %s2273_s14, 0 }
  0x14   : > { %p67_p3 = scmp.ne.s32.totalorder %s2257_s10, %s2253_s30  ;;  %s2991_s17 = smov (%p47_p0, %s45_s17), 0 }
  0x15   : > { %2949 = sst [smem:[#allocation23_spill]] %s2991_s17  ;;  %p2382_p4 = por %p62_p2, %p61_p1 }
  0x16   : > { %p68_p5 = scmp.eq.s32.totalorder %s2370_s15, 0  ;;  %s49_s20 = ssub.s32 %s2269_s13, %s2991_s17 }
  0x17   : > { %p2932_p6 = scmp.eq.s32.totalorder %s2370_s15, 1  ;;  %p52_p7 = scmp.eq.s32.totalorder %s49_s20, 0 }
  0x18   : > { %p2390_p8 = por %p68_p5, %p67_p3  ;;  %p225_p10 = scmp.eq.s32.totalorder %s2928_s16, 1 }
  0x19   : > { %p2396_p9 = por %p2932_p6, %p61_p1  ;;  %p1917_p13 = scmp.lt.s32.totalorder %s2273_s14, 2 }
  0x1a   : > { %s2951_s21 = scalar_select %p2390_p8, 1, 0 }
  0x1b   : > { %s2952_s22 = scalar_select %p2396_p9, 1, 0 }
  0x1c   : > { %s2403_s23 = scalar_select %p52_p7, %s2261_s11, %s54_s18  }
  0x1d   : > { %p2405_p11 = por %p225_p10, %p67_p3  ;;  %s2412_s25 = sand.u32 1, %s2261_s11  }
  0x1e   : > { %2953 = sst [smem:[#allocation24_spill]] %s2403_s23  ;;  %p2416_p0 = pnand %p1917_p13, %p2382_p4 }
  0x1f   : > { %s2954_s24 = scalar_select %p2405_p11, 1, 0 }
  0x20   : > { %s344_s27 = sand.u32 1, %s2273_s14   ;;  %s1587_s28 = sshll.u32 %s2412_s25, 6 }
  0x21   : > { %2955 = sst [smem:[#allocation25_spill]] %s2954_s24  ;;  %s1644_s29 = sshll.u32 %s2269_s13, 10 }
  0x22   : > { %s348_s18 = scalar_lea.vmem [#allocation5], %s1587_s28  ;;  %s2957_s1 = sld [smem:[#allocation27_spill]] }
  0x23   : > { %s357_s20 = sshll.u32 %s348_s18, 4  ;;  %s2430_s19 = scalar_lea.sflag [#allocation6], %s344_s27  ;;  %s2428_s20 = int_to_ptr.vmem [resolvable:$true] %s357_s20 }
  0x24   : > { %p2436_p2 = pneg %p2416_p0 }
  0x28   : > { %s2426_s23 = scalar_lea.hbm %s2957_s1, %s1644_s29  ;;  %s2010_s28 = scalar_lea.hbm %s2957_s1, 2048 }
  0x29   : > { %s2005_s11 = scalar_lea.hbm %s2426_s23, 1024  ;;  %p2011_p5 = scmp.lt.u32.totalorder %s2426_s23, %s2957_s1 }
  0x2a   : > { %p2006_p1 = scmp.ne.s32.totalorder %s2426_s23, %s2005_s11  ;;  %p2012_p7 = scmp.lt.u32.totalorder %s2010_s28, %s2005_s11 }
  0x2b   : > { %p2014_p13 = scmp.lt.u32.totalorder %s2005_s11, %s2426_s23 }
  0x2c   : > { %p2008_p3 = pnand %p2436_p2, %p2006_p1  ;;  %p2013_p10 = por %p2012_p7, %p2011_p5 }
  0x2e   : > { %p2009_p4 = pneg %p2008_p3  ;;  %p2015_p12 = por %p2014_p13, %p2013_p10 }
  0x30   : > { %p2016_p6 = pnand %p2015_p12, %p2009_p4 }
  0x32   : > { %2019 = shalt.err (!%p2016_p6)
}
  0x33   : > { %s2020_s27 = scalar_lea.vmem %s2428_s20, 1024  ;;  %s2275_s16 = smov [#allocation5]  }
  0x34   : > { %p2021_p1 = scmp.ne.s32.totalorder %s2428_s20, %s2020_s27  ;;  %s2025_s17 = sshll.u32 %s2275_s16, 4  ;;  %s2026_s17 = int_to_ptr.vmem [resolvable:$false] %s2025_s17 }
  0x35   : > { %s2027_s29 = scalar_lea.vmem %s2026_s17, 2048  ;;  %p2028_p9 = scmp.lt.s32.totalorder %s2428_s20, %s2026_s17 }
  0x36   : > { %p2023_p3 = pnand %p2021_p1, %p2436_p2  ;;  %p2029_p8 = scmp.lt.s32.totalorder %s2027_s29, %s2020_s27 }
  0x38   : > { %p2024_p11 = pneg %p2023_p3  ;;  %p2030_p5 = por %p2029_p8, %p2028_p9 }
  0x3a   : > { %p2031_p7 = pnand %p2030_p5, %p2024_p11 }
  0x3c   : > { %2034 = shalt.err (!%p2031_p7)
}
  0x3d   : > { %s2937_s11 = smov 128   ;;  %s2939_s28 = smov 8  }
  0x3e   : > { %1906 = dma.hbm_to_vmem [thread:$0]  (!%p2416_p0), %s2426_s23, 1024, %s2428_s20, %s2430_s19, %s2937_s11, %s2937_s11, %s2939_s28  }
  0x3f   : > { %p1593_p6 = scmp.ge.s32.totalorder %s2273_s14, 1  ;;  %p401_p8 = scmp.lt.s32.totalorder %s2273_s14, 3 }
  0x40   : > { %s1584_s27 = sshll.u32 %s2412_s25, 7  ;;  %s1643_s16 = sshll.u32 %s2269_s13, 11 }
  0x41   : > { %p2465_p9 = pnand %p1593_p6, %p401_p8  ;;  %s2960_s0 = sld [smem:[#allocation26_spill]] }
  0x42   : > { %s325_s30 = scalar_lea.vmem [#allocation2], %s1584_s27  ;;  %s1590_s23 = sshll.u32 %s2412_s25, 5 }
  0x43   : > { %s2959_s18 = scalar_select %p2465_p9, 1, 0 }
  0x44   : > { %s334_s9 = sshll.u32 %s325_s30, 4  ;;  %s322_s20 = scalar_lea.sflag [#allocation3], %s2412_s25  ;;  %s2477_s9 = int_to_ptr.vmem [resolvable:$true] %s334_s9 }
  0x47   : > { %s2474_s1 = scalar_lea.hbm %s2960_s0, %s1643_s16  ;;  %s2040_s16 = scalar_lea.hbm %s2960_s0, 4096 }
  0x48   : > { %s2035_s11 = scalar_lea.hbm %s2474_s1, 2048  ;;  %p2041_p10 = scmp.lt.u32.totalorder %s2474_s1, %s2960_s0 }
  0x49   : > { %p2036_p11 = scmp.ne.s32.totalorder %s2474_s1, %s2035_s11  ;;  %p2042_p13 = scmp.lt.u32.totalorder %s2040_s16, %s2035_s11 }
  0x4a   : > { %p2044_p3 = scmp.lt.u32.totalorder %s2035_s11, %s2474_s1 }
  0x4b   : > { %p2038_p12 = pnand %p2036_p11, %p2436_p2  ;;  %p2043_p1 = por %p2042_p13, %p2041_p10 }
  0x4d   : > { %p2039_p4 = pneg %p2038_p12  ;;  %p2045_p5 = por %p2044_p3, %p2043_p1 }
  0x4f   : > { %p2046_p7 = pnand %p2045_p5, %p2039_p4 }
  0x51   : > { %2049 = shalt.err (!%p2046_p7)
}
  0x52   : > { %s2050_s30 = scalar_lea.vmem %s2477_s9, 2048  ;;  %s2278_s14 = smov [#allocation2]  }
  0x53   : > { %p2051_p6 = scmp.ne.s32.totalorder %s2477_s9, %s2050_s30  ;;  %s2055_s28 = sshll.u32 %s2278_s14, 4  ;;  %s2056_s28 = int_to_ptr.vmem [resolvable:$false] %s2055_s28 }
  0x54   : > { %s2057_s27 = scalar_lea.vmem %s2056_s28, 4096  ;;  %p2058_p12 = scmp.lt.s32.totalorder %s2477_s9, %s2056_s28 }
  0x55   : > { %p2053_p8 = pnand %p2051_p6, %p2436_p2  ;;  %p2059_p9 = scmp.lt.s32.totalorder %s2057_s27, %s2050_s30 }
  0x57   : > { %p2054_p11 = pneg %p2053_p8  ;;  %p2060_p10 = por %p2059_p9, %p2058_p12 }
  0x59   : > { %p2061_p13 = pnand %p2060_p10, %p2054_p11 }
  0x5b   : > { %2064 = shalt.err (!%p2061_p13)
}
  0x5c   : > { %s2961_s11 = smov 8   ;;  %s2962_s16 = smov 128  }
  0x5d   : > { %1903 = dma.hbm_to_vmem [thread:$0]  (!%p2416_p0), %s2474_s1, 2048, %s2477_s9, %s322_s20, %s2962_s16, %s2962_s16, %s2961_s11  }
  0x5e   : > { %s1645_s17 = sshll.u32 %s2269_s13, 9  ;;  %s371_s29 = scalar_lea.vmem [#allocation7], %s1590_s23 }
  0x5f   : > { %s380_s30 = sshll.u32 %s371_s29, 4  ;;  %s2512_s27 = scalar_lea.hbm %s2920_s2, %s1645_s17  ;;  %s2514_s30 = int_to_ptr.vmem [resolvable:$true] %s380_s30 }
  0x60   : > { %s2065_s0 = scalar_lea.hbm %s2512_s27, 512  ;;  %s2070_s25 = scalar_lea.hbm %s2920_s2, 1024 }
  0x61   : > { %p2066_p9 = scmp.ne.s32.totalorder %s2512_s27, %s2065_s0  ;;  %p2071_p3 = scmp.lt.u32.totalorder %s2512_s27, %s2920_s2 }
  0x62   : > { %p2072_p5 = scmp.lt.u32.totalorder %s2070_s25, %s2065_s0  ;;  %p2074_p6 = scmp.lt.u32.totalorder %s2065_s0, %s2512_s27 }
  0x63   : > { %p2068_p4 = pnand %p2066_p9, %p2436_p2 }
  0x64   : > { %p2073_p7 = por %p2072_p5, %p2071_p3 }
  0x65   : > { %p2069_p1 = pneg %p2068_p4 }
  0x66   : > { %p2075_p8 = por %p2074_p6, %p2073_p7 }
  0x68   : > { %p2076_p11 = pnand %p2075_p8, %p2069_p1 }
  0x6a   : > { %2079 = shalt.err (!%p2076_p11)
}
  0x6b   : > { %s2080_s17 = scalar_lea.vmem %s2514_s30, 512  ;;  %s2279_s29 = smov [#allocation7]  }
  0x6c   : > { %p2081_p12 = scmp.ne.s32.totalorder %s2514_s30, %s2080_s17  ;;  %s2085_s14 = sshll.u32 %s2279_s29, 4  ;;  %s2086_s14 = int_to_ptr.vmem [resolvable:$false] %s2085_s14 }
  0x6d   : > { %s2087_s28 = scalar_lea.vmem %s2086_s14, 1024  ;;  %p2088_p9 = scmp.lt.s32.totalorder %s2514_s30, %s2086_s14 }
  0x6e   : > { %p2083_p10 = pnand %p2081_p12, %p2436_p2  ;;  %p2089_p4 = scmp.lt.s32.totalorder %s2087_s28, %s2080_s17 }
  0x70   : > { %p2084_p13 = pneg %p2083_p10  ;;  %p2090_p3 = por %p2089_p4, %p2088_p9 }
  0x72   : > { %p2091_p5 = pnand %p2090_p3, %p2084_p13 }
  0x74   : > { %2094 = shalt.err (!%p2091_p5)
}
  0x75   : > { %1909 = dma.hbm_to_vmem [thread:$0]  (!%p2416_p0), %s2512_s27, 512, %s2514_s30, %s2430_s19, %s2962_s16, %s2962_s16, %s2961_s11  }
  0x76   : > { %p2963_p2 = scmp.ne.s32.totalorder %s2959_s18, 0 }
  0x77   : > { %s2544_s0 = sand.u32 (!%p2963_p2), 1, %s2257_s10   ;;  %p2964_p1 = scmp.ne.s32.totalorder (!%p2963_p2), %s2951_s21, 0 }
  0x78   : > { %405 = sbr.rel (%p2963_p2) target bundleno = 983 (0x3d7), region = 44  ;;  %s1594_s24 = sshll.u32 (!%p2963_p2), %s2544_s0, 7 }
  0x79   : > { %s408_s1 = scalar_lea.sflag (!%p2963_p2), [#allocation3], %s2544_s0  ;;  %s2548_s9 = scalar_lea.vmem (!%p2963_p2), [#allocation2], %s1594_s24 }
  0x7f   : > { %2228 = dma.done.wait (%p2964_p1), %s408_s1, 2048  }
  0x80   : > { %2230 = vsyncadd (%p2964_p1), %s408_s1, 4294965248  ;;  %s416_s26 = sand.u32 1, %s2370_s15   ;;  %s1595_s19 = sshll.u32 %s2544_s0, 6 }
  0x81   : > { %s417_s18 = scalar_lea.sflag [#allocation6], %s416_s26  ;;  %s2558_s11 = scalar_lea.vmem [#allocation5], %s1595_s19 }
  0x82   : > { %2232 = dma.done.wait (%p2964_p1), %s417_s18, 1536  }
  0x83   : > { %2234 = vsyncadd (%p2964_p1), %s417_s18, 4294965760  ;;  %s1596_s16 = sshll.u32 %s2544_s0, 5  ;;  %s1598_s30 = sshll.u32 %s2544_s0, 4 }
  0x84   : > { %p492_p0 = scmp.lt.s32.totalorder %s2265_s12, 1  ;;  %p504_p7 = scmp.eq.s32.totalorder %s2265_s12, 0 }
  0x85   : > { %s2574_s29 = scalar_lea.vmem [#allocation7], %s1596_s16  ;;  %s2576_s21 = scalar_lea.vmem [#allocation8], %s1596_s16  ;;  %v2280_v0 = vmov (%p504_p7), 0.0  }
  0x86   : > { %s493_s27 = scalar_select %p492_p0, %s2265_s12, 1 }
  0x87   : > { %s2578_s14 = scalar_lea.vmem [#allocation9], %s1598_s30  ;;  %509 = sbr.rel (!%p504_p7) target bundleno = 142 (0x8e), region = 60  ;;  %510 = vst [vmem:[#allocation11] sm:$0x1] (%p504_p7), %v2280_v0  ;;  %511 = vst [vmem:[#allocation12] sm:$0x1] (%p504_p7), %v2280_v0 }
  0x88   : > { %s1646_s25 = sshll.u32 %s493_s27, 4 }
  0x89   : > { %s2572_s17 = scalar_lea.vmem %s2921_s3, %s1646_s25 }
  0x8e PF: > { %v512_v1 = vld [vmem:[%s2548_s9] sm:$0xff]  ;;  %v513_v2 = vld [vmem:[%s2548_s9 + $0x8] sm:$0xff]  ;;  %v514_v3 = vld [vmem:[%s2548_s9 + $0x10] sm:$0xff]  ;;  %v2281_v4 = vmov 0.0   ;;  %vm2282_vm0 = vmmov 0   ;;  %vm576_vm1 = vcmask 523264  }
  0x8f   : > { %1710 = vmatprep.subr.bf16.mxu0 %v2281_v4  ;;  %v547_v5 = vpack.c.bf16 %v513_v2, %v512_v1  ;;  %v515_v6 = vld [vmem:[%s2548_s9 + $0x18] sm:$0xff]  ;;  %v516_v7 = vld [vmem:[%s2548_s9 + $0x20] sm:$0xff]  ;;  %v517_v8 = vld [vmem:[%s2548_s9 + $0x28] sm:$0xff]  ;;  %1718 = vmatprep.mubr.msk.bf16.mxu0 %vm2282_vm0, %v2281_v4  ;;  %vm1231_vm2 = vcmask 130048   ;;  %s1649_s25 = sshll.u32 %s2265_s12, 8  ;;  %s1348_s23 = sshll.u32 %s2578_s14, 4  ;;  %s2782_s23 = int_to_ptr.vmem [resolvable:$true] %s1348_s23 }
  0x90   : > { %v548_v9 = vpack.c.bf16 %v515_v6, %v514_v3  ;;  %v549_v10 = vpack.c.bf16 %v517_v8, %v516_v7  ;;  %v518_v11 = vld [vmem:[%s2548_s9 + $0x30] sm:$0xff]  ;;  %v519_v12 = vld [vmem:[%s2548_s9 + $0x38] sm:$0xff]  ;;  %1734 = vmatprep.subr.bf16.mxu1 %v2281_v4  ;;  %1742 = vmatprep.mubr.msk.bf16.mxu1 %vm2282_vm0, %v2281_v4  ;;  %v2597_v30 = vld [vmem:[%s2923_s5] sm:$0xff]   ;;  %s2786_s28 = scalar_lea.sflag [#allocation10], %s416_s26  ;;  %s2095_s24 = scalar_lea.vmem %s2782_s23, 256 }
  0x91   : > { %v551_v13 = vunpack.c.l.bf16 %v547_v5  ;;  %v552_v14 = vunpack.c.h.bf16 %v547_v5  ;;  %v550_v17 = vpack.c.bf16 %v519_v12, %v518_v11  ;;  %v2603_v31 = vld [vmem:[%s2923_s5 + $0x8] sm:$0xff]   ;;  %1735 = vmatpush3.bf16.msra.mxu1 %v2597_v30  ;;  %v2614_v36 = vld [vmem:[%s2922_s4] sm:$0xff]   ;;  %v1604_v40 = vld [vmem:[%s2548_s9 + $0x50] sm:$0xff]  ;;  %p2096_p6 = scmp.ne.s32.totalorder %s2782_s23, %s2095_s24  ;;  %p2965_p8 = scmp.ne.s32.totalorder %s2952_s22, 0 }
  0x92   : > { %v553_v15 = vunpack.c.l.bf16 %v548_v9  ;;  %v554_v16 = vunpack.c.h.bf16 %v548_v9  ;;  %v555_v20 = vunpack.c.l.bf16 %v549_v10  ;;  %v556_v21 = vunpack.c.h.bf16 %v549_v10  ;;  %1736 = vmatprep.subr.bf16.mxu1 %v2281_v4  ;;  %v1602_v37 = vld [vmem:[%s2548_s9 + $0x40] sm:$0xff]  ;;  %v1603_v38 = vld [vmem:[%s2548_s9 + $0x48] sm:$0xff]  ;;  %v1605_v41 = vld [vmem:[%s2548_s9 + $0x58] sm:$0xff]  ;;  %s2283_s1 = smov [#allocation9]  }
  0x93   : > { %v559_v18 = vsub.f32 %v512_v1, %v551_v13  ;;  %v560_v19 = vsub.f32 %v513_v2, %v552_v14  ;;  %v557_v25 = vunpack.c.l.bf16 %v550_v17  ;;  %v558_v29 = vunpack.c.h.bf16 %v550_v17  ;;  %v1606_v45 = vld [vmem:[%s2548_s9 + $0x60] sm:$0xff]  ;;  %v1607_v46 = vld [vmem:[%s2548_s9 + $0x68] sm:$0xff]  ;;  %v1608_v52 = vld [vmem:[%s2548_s9 + $0x70] sm:$0xff]  ;;  %p2097_p11 = pnand %p2096_p6, %p2965_p8 }
  0x94   : > { %v561_v22 = vsub.f32 %v514_v3, %v553_v15  ;;  %v562_v23 = vsub.f32 %v515_v6, %v554_v16  ;;  %v563_v27 = vsub.f32 %v516_v7, %v555_v20  ;;  %v564_v28 = vsub.f32 %v517_v8, %v556_v21  ;;  %v1609_v53 = vld [vmem:[%s2548_s9 + $0x78] sm:$0xff]  ;;  %v529_v6 = vld [vmem:[%s2558_s11] sm:$0xff]  ;;  %v530_v7 = vld [vmem:[%s2558_s11 + $0x8] sm:$0xff] }
  0x95   : > { %v567_v24 = vpack.c.bf16 %v560_v19, %v559_v18  ;;  %v565_v33 = vsub.f32 %v518_v11, %v557_v25  ;;  %v566_v34 = vsub.f32 %v519_v12, %v558_v29  ;;  %1737 = vmatpush3.bf16.msra.mxu1 %v2603_v31  ;;  %v782_v39 = vpack.c.bf16 %v1603_v38, %v1602_v37  ;;  %v533_v14 = vld [vmem:[%s2558_s11 + $0x20] sm:$0xff]  ;;  %v534_v15 = vld [vmem:[%s2558_s11 + $0x28] sm:$0xff]  ;;  %v535_v21 = vld [vmem:[%s2558_s11 + $0x30] sm:$0xff]  ;;  %p2098_p12 = pneg %p2097_p11 }
  0x96   : > { %v568_v26 = vpack.c.bf16 %v562_v23, %v561_v22  ;;  %v569_v32 = vpack.c.bf16 %v564_v28, %v563_v27  ;;  %1738 = vmatprep.subr.bf16.mxu1 %v2281_v4  ;;  %v783_v44 = vpack.c.bf16 %v1605_v41, %v1604_v40  ;;  %v784_v47 = vpack.c.bf16 %v1607_v46, %v1606_v45  ;;  %v536_v22 = vld [vmem:[%s2558_s11 + $0x38] sm:$0xff] }
  0x97   : > { %1711 = vmatpush3.bf16.msra.mxu0 %v567_v24  ;;  %v570_v35 = vpack.c.bf16 %v566_v34, %v565_v33  ;;  %v786_v42 = vunpack.c.l.bf16 %v782_v39  ;;  %v787_v43 = vunpack.c.h.bf16 %v782_v39  ;;  %v785_v55 = vpack.c.bf16 %v1609_v53, %v1608_v52 }
  0x98   : > { %1712 = vmatprep.subr.bf16.mxu0 %v2281_v4  ;;  %v788_v50 = vunpack.c.l.bf16 %v783_v44  ;;  %v789_v51 = vunpack.c.h.bf16 %v783_v44  ;;  %v790_v54 = vunpack.c.l.bf16 %v784_v47  ;;  %v791_v59 = vunpack.c.h.bf16 %v784_v47 }
  0x99   : > { %v794_v48 = vsub.f32 %v1602_v37, %v786_v42  ;;  %v795_v49 = vsub.f32 %v1603_v38, %v787_v43  ;;  %v792_v60 = vunpack.c.l.bf16 %v785_v55  ;;  %v793_v0 = vunpack.c.h.bf16 %v785_v55  ;;  %v2684_v42 = vld [vmem:[%s2923_s5 + $0x18] sm:$0xff]  }
  0x9a   : > { %v796_v57 = vsub.f32 %v1604_v40, %v788_v50  ;;  %v797_v58 = vsub.f32 %v1605_v41, %v789_v51  ;;  %v798_v62 = vsub.f32 %v1606_v45, %v790_v54  ;;  %v799_v63 = vsub.f32 %v1607_v46, %v791_v59  ;;  %v2677_v41 = vld [vmem:[%s2923_s5 + $0x10] sm:$0xff]  }
  0x9b   : > { %1713 = vmatpush3.bf16.msra.mxu0 %v568_v26  ;;  %v802_v56 = vpack.c.bf16 %v795_v49, %v794_v48  ;;  %v800_v2 = vsub.f32 %v1608_v52, %v792_v60  ;;  %v801_v3 = vsub.f32 %v1609_v53, %v793_v0  ;;  %v984_v8 = vpack.c.bf16 %v530_v7, %v529_v6 }
  0x9c   : > { %1714 = vmatprep.subr.bf16.mxu0 %v2281_v4  ;;  %v803_v61 = vpack.c.bf16 %v797_v58, %v796_v57  ;;  %v804_v1 = vpack.c.bf16 %v799_v63, %v798_v62  ;;  %v986_v16 = vpack.c.bf16 %v534_v15, %v533_v14  ;;  %v987_v24 = vpack.c.bf16 %v536_v22, %v535_v21 }
  0x9d   : > { %v988_v11 = vunpack.c.l.bf16 %v984_v8  ;;  %v989_v12 = vunpack.c.h.bf16 %v984_v8  ;;  %1739 = vmatpush3.bf16.msra.mxu1 %v2677_v41 }
  0x9e   : > { %v992_v23 = vunpack.c.l.bf16 %v986_v16  ;;  %v993_v28 = vunpack.c.h.bf16 %v986_v16  ;;  %v994_v29 = vunpack.c.l.bf16 %v987_v24  ;;  %1740 = vmatprep.subr.bf16.mxu1 %v2281_v4 }
  0x9f   : > { %1715 = vmatpush3.bf16.msra.mxu0 %v569_v32  ;;  %v997_v18 = vsub.f32 %v530_v7, %v989_v12 }
  0xa0   : > { %1716 = vmatprep.subr.bf16.mxu0 %v2281_v4  ;;  %v1000_v33 = vsub.f32 %v533_v14, %v992_v23  ;;  %v1001_v34 = vsub.f32 %v534_v15, %v993_v28  ;;  %v1002_v38 = vsub.f32 %v535_v21, %v994_v29  ;;  %v2751_v14 = vld [vmem:[%s2572_s17 + $0x8] sm:$0xff]  ;;  %v1188_v21 = vld [vmem:[%s2574_s29] sm:$0xff]  ;;  %v1627_v28 = vld [vmem:[%s2574_s29 + $0x10] sm:$0xff] }
  0xa1   : > { %1741 = vmatpush3.bf16.msra.mxu1 %v2684_v42  ;;  %v1251_v15 = vand.u32 2147483647, %v2751_v14 }
  0xa2   : > { %v1006_v37 = vpack.c.bf16 %v1001_v34, %v1000_v33  ;;  %1746 = vmatprep.subr.bf16.mxu1 %v2281_v4 }
  0xa3   : > { %1717 = vmatpush3.bf16.msra.mxu0 %v570_v35  ;;  %v995_v35 = vunpack.c.h.bf16 %v987_v24 }
  0xa4   : > { %1722 = vmatprep.subr.bf16.mxu0 %v2281_v4 }
  0xa6   : > { %1719 = vmatmul.mubr.msk.bf16.vlgmr.msra.gmra.mrb[0].mxu0 %vm576_vm1, %v2614_v36 }
  0xa7   : > { %1723 = vmatpush3.bf16.msra.mxu0 %v547_v5  ;;  %1730 = vmatprep.mubr.msk.bf16.mxu0 %vm2282_vm0, %v2281_v4  ;;  %v805_v5 = vpack.c.bf16 %v801_v3, %v800_v2 }
  0xa8   : > { %1724 = vmatprep.subr.bf16.mxu0 %v2281_v4 }
  0xab   : > { %1725 = vmatpush3.bf16.msra.mxu0 %v548_v9  ;;  %v531_v9 = vld [vmem:[%s2558_s11 + $0x10] sm:$0xff] }
  0xac   : > { %1726 = vmatprep.subr.bf16.mxu0 %v2281_v4 }
  0xaf   : > { %1727 = vmatpush3.bf16.msra.mxu0 %v549_v10  ;;  %v532_v10 = vld [vmem:[%s2558_s11 + $0x18] sm:$0xff] }
  0xb0   : > { %1728 = vmatprep.subr.bf16.mxu0 %v2281_v4  ;;  %v985_v13 = vpack.c.bf16 %v532_v10, %v531_v9 }
  0xb2   : > { %v990_v19 = vunpack.c.l.bf16 %v985_v13  ;;  %v991_v20 = vunpack.c.h.bf16 %v985_v13 }
  0xb3   : > { %1729 = vmatpush3.bf16.msra.mxu0 %v550_v17  ;;  %v996_v17 = vsub.f32 %v529_v6, %v988_v11 }
  0xb4   : > { %1758 = vmatprep.subr.bf16.mxu0 %v2281_v4  ;;  %v998_v26 = vsub.f32 %v531_v9, %v990_v19  ;;  %v999_v27 = vsub.f32 %v532_v10, %v991_v20 }
  0xb5   : > { %v1004_v25 = vpack.c.bf16 %v997_v18, %v996_v17  ;;  %v1253_v17 = vsub.f32 0.0, %v1251_v15 }
  0xb6   : > { %1731 = vmatmul.mubr.msk.bf16.vlgmr.msra.gmra.mrb[0].mxu0 %vm576_vm1, %v2614_v36  ;;  %v1005_v32 = vpack.c.bf16 %v999_v27, %v998_v26  ;;  %v1189_v27 = vld [vmem:[%s2574_s29 + $0x8] sm:$0xff] }
  0xb7   : > { %1759 = vmatpush3.bf16.msra.mxu0 %v802_v56  ;;  %1766 = vmatprep.mubr.msk.bf16.mxu0 %vm2282_vm0, %v2281_v4  ;;  %v1256_v19 = vmul.f32 1.442695, %v1253_v17 }
  0xb8   : > { %1760 = vmatprep.subr.bf16.mxu0 %v2281_v4 }
  0xbb   : > { %1761 = vmatpush3.bf16.msra.mxu0 %v803_v61 }
  0xbc   : > { %1762 = vmatprep.subr.bf16.mxu0 %v2281_v4 }
  0xbf   : > { %1763 = vmatpush3.bf16.msra.mxu0 %v804_v1 }
  0xc0   : > { %1764 = vmatprep.subr.bf16.mxu0 %v2281_v4 }
  0xc3   : > { %1765 = vmatpush3.bf16.msra.mxu0 %v805_v5 }
  0xc4   : > { %1770 = vmatprep.subr.bf16.mxu0 %v2281_v4 }
  0xc6   : > { %1767 = vmatmul.mubr.msk.bf16.vlgmr.msra.gmra.mrb[4].mxu0 %vm576_vm1, %v2614_v36 }
  0xc7   : > { %1771 = vmatpush3.bf16.msra.mxu0 %v782_v39  ;;  %1778 = vmatprep.mubr.msk.bf16.mxu0 %vm2282_vm0, %v2281_v4  ;;  %v1003_v39 = vsub.f32 %v536_v22, %v995_v35 }
  0xc8   : > { %1772 = vmatprep.subr.bf16.mxu0 %v2281_v4 }
  0xc9   : > { %v1007_v40 = vpack.c.bf16 %v1003_v39, %v1002_v38  ;;  %v1628_v38 = vld [vmem:[%s2574_s29 + $0x18] sm:$0xff]  ;;  %s2780_s29 = scalar_lea.hbm %s2925_s7, %s1649_s25 }
  0xcb   : > { %1773 = vmatpush3.bf16.msra.mxu0 %v783_v44 }
  0xcc   : > { %1774 = vmatprep.subr.bf16.mxu0 %v2281_v4 }
  0xcf   : > { %1775 = vmatpush3.bf16.msra.mxu0 %v784_v47 }
  0xd0   : > { %1776 = vmatprep.subr.bf16.mxu0 %v2281_v4 }
  0xd3   : > { %1777 = vmatpush3.bf16.msra.mxu0 %v785_v55 }
  0xd4   : > { %1806 = vmatprep.subr.bf16.mxu0 %v2281_v4 }
  0xd6   : > { %1779 = vmatmul.mubr.msk.bf16.vlgmr.msra.gmra.mrb[4].mxu0 %vm576_vm1, %v2614_v36 }
  0xd7   : > { %1807 = vmatpush3.bf16.msra.mxu0 %v1004_v25  ;;  %1814 = vmatprep.mubr.msk.bf16.mxu0 %vm2282_vm0, %v2281_v4 }
  0xd8   : > { %1808 = vmatprep.subr.bf16.mxu0 %v2281_v4 }
  0xdb   : > { %1809 = vmatpush3.bf16.msra.mxu0 %v1005_v32 }
  0xdc   : > { %1810 = vmatprep.subr.bf16.mxu0 %v2281_v4 }
  0xdf   : > { %1811 = vmatpush3.bf16.msra.mxu0 %v1006_v37 }
  0xe0   : > { %1812 = vmatprep.subr.bf16.mxu0 %v2281_v4 }
  0xe3   : > { %1813 = vmatpush3.bf16.msra.mxu0 %v1007_v40 }
  0xe4   : > { %1818 = vmatprep.subr.bf16.mxu0 %v2281_v4 }
  0xe6   : > { %1815 = vmatmul.mubr.msk.bf16.vlgmr.msra.gmra.mrb[8].mxu0 %vm576_vm1, %v2614_v36 }
  0xe7   : > { %1819 = vmatpush3.bf16.msra.mxu0 %v984_v8  ;;  %1826 = vmatprep.mubr.msk.bf16.mxu0 %vm2282_vm0, %v2281_v4 }
  0xe8   : > { %1820 = vmatprep.subr.bf16.mxu0 %v2281_v4 }
  0xeb   : > { %1821 = vmatpush3.bf16.msra.mxu0 %v985_v13  ;;  %v2748_v13 = vld [vmem:[%s2572_s17] sm:$0xff] }
  0xec   : > { %1822 = vmatprep.subr.bf16.mxu0 %v2281_v4 }
  0xef   : > { %1823 = vmatpush3.bf16.msra.mxu0 %v986_v16 }
  0xf0   : > { %1824 = vmatprep.subr.bf16.mxu0 %v2281_v4 }
  0xf3   : > { %1825 = vmatpush3.bf16.msra.mxu0 %v987_v24 }
  0xf6   : > { %1827 = vmatmul.mubr.msk.bf16.vlgmr.msra.gmra.mrb[8].mxu0 %vm576_vm1, %v2614_v36 }
 0x189   : > { %v655_v43 = vpop.f32.mrb[0].mxu0 }
 0x18a   : > { %v1732_v36 = vpop.f32.mrb[1].mxu0 }
 0x18b   : > { %v658_v44 = vpop.f32.mrb[2].mxu0 }
 0x18c   : > { %v662_v45 = vpack.c.bf16 %v658_v44, %v655_v43  ;;  %v1733_v46 = vpop.f32.mrb[3].mxu0 }
 0x18e   : > { %v663_v47 = vunpack.c.l.bf16 %v662_v45  ;;  %v664_v48 = vunpack.c.h.bf16 %v662_v45 }
 0x190   : > { %v665_v49 = vsub.f32 %v655_v43, %v663_v47  ;;  %v666_v50 = vsub.f32 %v658_v44, %v664_v48 }
 0x192   : > { %v667_v51 = vpack.c.bf16 %v666_v50, %v665_v49 }
 0x194   : > { %1743 = vmatmul.mubr.msk.bf16.vlgmr.msra.gmra.mrb[0].mxu1 %vm576_vm1, %v667_v51 }
 0x195   : > { %1747 = vmatpush3.bf16.msra.mxu1 %v2597_v30  ;;  %1754 = vmatprep.mubr.msk.bf16.mxu1 %vm2282_vm0, %v2281_v4 }
 0x196   : > { %1748 = vmatprep.subr.bf16.mxu1 %v2281_v4 }
 0x199   : > { %1749 = vmatpush3.bf16.msra.mxu1 %v2603_v31 }
 0x19a   : > { %1750 = vmatprep.subr.bf16.mxu1 %v2281_v4 }
 0x19d   : > { %1751 = vmatpush3.bf16.msra.mxu1 %v2677_v41 }
 0x19e   : > { %1752 = vmatprep.subr.bf16.mxu1 %v2281_v4 }
 0x1a1   : > { %1753 = vmatpush3.bf16.msra.mxu1 %v2684_v42 }
 0x1a2   : > { %1782 = vmatprep.subr.bf16.mxu1 %v2281_v4 }
 0x1a4   : > { %1755 = vmatmul.mubr.msk.bf16.vlgmr.msra.gmra.mrb[0].mxu1 %vm576_vm1, %v662_v45 }
 0x1a5   : > { %1783 = vmatpush3.bf16.msra.mxu1 %v2597_v30  ;;  %1790 = vmatprep.mubr.msk.bf16.mxu1 %vm2282_vm0, %v2281_v4 }
 0x1a6   : > { %1784 = vmatprep.subr.bf16.mxu1 %v2281_v4 }
 0x1a9   : > { %1785 = vmatpush3.bf16.msra.mxu1 %v2603_v31  ;;  %v881_v52 = vpop.f32.mrb[4].mxu0 }
 0x1aa   : > { %v1780_v53 = vpop.f32.mrb[5].mxu0  ;;  %1786 = vmatprep.subr.bf16.mxu1 %v2281_v4 }
 0x1ab   : > { %v884_v54 = vpop.f32.mrb[6].mxu0  ;;  %v1248_v53 = vmax.f32 %v2748_v13, 0.0 }
 0x1ac   : > { %v888_v55 = vpack.c.bf16 %v884_v54, %v881_v52  ;;  %v1781_v56 = vpop.f32.mrb[7].mxu0 }
 0x1ad   : > { %1787 = vmatpush3.bf16.msra.mxu1 %v2677_v41 }
 0x1ae   : > { %v889_v57 = vunpack.c.l.bf16 %v888_v55  ;;  %v890_v58 = vunpack.c.h.bf16 %v888_v55  ;;  %1788 = vmatprep.subr.bf16.mxu1 %v2281_v4 }
 0x1b0   : > { %v891_v59 = vsub.f32 %v881_v52, %v889_v57  ;;  %v892_v60 = vsub.f32 %v884_v54, %v890_v58  ;;  %v1249_v57 = vmax.f32 %v2751_v14, 0.0 }
 0x1b1   : > { %1789 = vmatpush3.bf16.msra.mxu1 %v2684_v42 }
 0x1b2   : > { %v893_v61 = vpack.c.bf16 %v892_v60, %v891_v59  ;;  %1794 = vmatprep.subr.bf16.mxu1 %v2281_v4 }
 0x1b4   : > { %1791 = vmatmul.mubr.msk.bf16.vlgmr.msra.gmra.mrb[4].mxu1 %vm576_vm1, %v893_v61 }
 0x1b5   : > { %1795 = vmatpush3.bf16.msra.mxu1 %v2597_v30  ;;  %1802 = vmatprep.mubr.msk.bf16.mxu1 %vm2282_vm0, %v2281_v4 }
 0x1b6   : > { %1796 = vmatprep.subr.bf16.mxu1 %v2281_v4 }
 0x1b9   : > { %1797 = vmatpush3.bf16.msra.mxu1 %v2603_v31 }
 0x1ba   : > { %1798 = vmatprep.subr.bf16.mxu1 %v2281_v4 }
 0x1bd   : > { %1799 = vmatpush3.bf16.msra.mxu1 %v2677_v41 }
 0x1be   : > { %1800 = vmatprep.subr.bf16.mxu1 %v2281_v4 }
 0x1c1   : > { %1801 = vmatpush3.bf16.msra.mxu1 %v2684_v42 }
 0x1c2   : > { %1830 = vmatprep.subr.bf16.mxu1 %v2281_v4 }
 0x1c4   : > { %1803 = vmatmul.mubr.msk.bf16.vlgmr.msra.gmra.mrb[4].mxu1 %vm576_vm1, %v888_v55 }
 0x1c5   : > { %1831 = vmatpush3.bf16.msra.mxu1 %v2597_v30  ;;  %1838 = vmatprep.mubr.msk.bf16.mxu1 %vm2282_vm0, %v2281_v4 }
 0x1c6   : > { %1832 = vmatprep.subr.bf16.mxu1 %v2281_v4 }
 0x1c9   : > { %1833 = vmatpush3.bf16.msra.mxu1 %v2603_v31  ;;  %v1083_v62 = vpop.f32.mrb[8].mxu0 }
 0x1ca   : > { %v1828_v63 = vpop.f32.mrb[9].mxu0  ;;  %1834 = vmatprep.subr.bf16.mxu1 %v2281_v4 }
 0x1cb   : > { %v1086_v0 = vpop.f32.mrb[10].mxu0 }
 0x1cc   : > { %v1090_v1 = vpack.c.bf16 %v1086_v0, %v1083_v62  ;;  %v1829_v2 = vpop.f32.mrb[11].mxu0 }
 0x1cd   : > { %1835 = vmatpush3.bf16.msra.mxu1 %v2677_v41 }
 0x1ce   : > { %v1091_v3 = vunpack.c.l.bf16 %v1090_v1  ;;  %v1092_v5 = vunpack.c.h.bf16 %v1090_v1  ;;  %1836 = vmatprep.subr.bf16.mxu1 %v2281_v4 }
 0x1d0   : > { %v1093_v6 = vsub.f32 %v1083_v62, %v1091_v3  ;;  %v1094_v7 = vsub.f32 %v1086_v0, %v1092_v5 }
 0x1d1   : > { %1837 = vmatpush3.bf16.msra.mxu1 %v2684_v42 }
 0x1d2   : > { %v1095_v8 = vpack.c.bf16 %v1094_v7, %v1093_v6  ;;  %1842 = vmatprep.subr.bf16.mxu1 %v2281_v4 }
 0x1d4   : > { %1839 = vmatmul.mubr.msk.bf16.vlgmr.msra.gmra.mrb[8].mxu1 %vm576_vm1, %v1095_v8 }
 0x1d5   : > { %1843 = vmatpush3.bf16.msra.mxu1 %v2597_v30  ;;  %1850 = vmatprep.mubr.msk.bf16.mxu1 %vm2282_vm0, %v2281_v4 }
 0x1d6   : > { %1844 = vmatprep.subr.bf16.mxu1 %v2281_v4 }
 0x1d9   : > { %1845 = vmatpush3.bf16.msra.mxu1 %v2603_v31 }
 0x1da   : > { %1846 = vmatprep.subr.bf16.mxu1 %v2281_v4 }
 0x1dd   : > { %1847 = vmatpush3.bf16.msra.mxu1 %v2677_v41 }
 0x1de   : > { %1848 = vmatprep.subr.bf16.mxu1 %v2281_v4  ;;  %v1250_v4 = vand.u32 2147483647, %v2748_v13 }
 0x1e0   : > { %v1252_v16 = vsub.f32 0.0, %v1250_v4 }
 0x1e1   : > { %1849 = vmatpush3.bf16.msra.mxu1 %v2684_v42 }
 0x1e2   : > { %v1254_v18 = vmul.f32 1.442695, %v1252_v16 }
 0x1e4   : > { %1851 = vmatmul.mubr.msk.bf16.vlgmr.msra.gmra.mrb[8].mxu1 %vm576_vm1, %v1090_v1  ;;  %1985 = vpow2.f32 %v1254_v18 }
 0x1e5   : > { %1987 = vpow2.f32 %v1256_v19 }
 0x1ee   : > { %v1986_v23 = vpop.eup %1985 }
 0x1ef   : > { %v1988_v32 = vpop.eup %1987  ;;  %v1258_v39 = vadd.f32 1.0, %v1986_v23 }
 0x1f0   : > { %v1259_v43 = vadd.f32 1.0, %v1988_v32 }
 0x1f1   : > { %1989 = vlog2.f32 %v1258_v39 }
 0x1f2   : > { %1991 = vlog2.f32 %v1259_v43 }
 0x1fb   : > { %v1990_v50 = vpop.eup %1989 }
 0x1fc   : > { %v1992_v51 = vpop.eup %1991  ;;  %v1261_v54 = vmul.f32 0.6931472, %v1990_v50 }
 0x1fd   : > { %v1263_v58 = vmul.f32 0.6931472, %v1992_v51 }
 0x1fe   : > { %v1264_v62 = vadd.f32 %v1261_v54, %v1248_v53 }
 0x1ff   : > { %v1265_v3 = vadd.f32 %v1263_v58, %v1249_v57 }
 0x200   : > { %v1266_v7 = vsub.f32 %v1264_v62, %v2748_v13 }
 0x201   : > { %v1267_v8 = vsub.f32 %v1265_v3, %v2751_v14  ;;  %v1275_v18 = vmin.f32 %v1265_v3, 100.0 }
 0x203   : > { %v1269_v16 = vmin.f32 %v1267_v8, 100.0 }
 0x277   : > { %v773_v30 = vpop.f32.mrb[0].mxu1 }
 0x278   : > { %v780_v9 = vmul.f32 0.0625, %v773_v30  ;;  %v1756_v10 = vpop.f32.mrb[1].mxu1 }
 0x279   : > { %v776_v11 = vpop.f32.mrb[2].mxu1  ;;  %v1268_v10 = vmin.f32 %v1266_v7, 100.0 }
 0x27a   : > { %1294 = vst.msk [vmem:[%s2576_s21] sm:$0xff] %vm1231_vm2, %v780_v9  ;;  %v781_v31 = vmul.f32 0.0625, %v776_v11  ;;  %v1757_v12 = vpop.f32.mrb[3].mxu1  ;;  %v1186_v20 = vmul.f32 0.05, %v780_v9 }
 0x27c   : > { %1295 = vst.msk [vmem:[%s2576_s21 + $0x8] sm:$0xff] %vm1231_vm2, %v781_v31  ;;  %v1187_v24 = vmul.f32 0.05, %v781_v31  ;;  %v1190_v33 = vsub.f32 %v1186_v20, %v1188_v21  ;;  %v1274_v31 = vmin.f32 %v1264_v62, 100.0 }
 0x27e   : > { %v1191_v40 = vsub.f32 %v1187_v24, %v1189_v27  ;;  %v1199_v36 = vmul.f32 %v1190_v33, %v1190_v33 }
 0x280   : > { %v1200_v46 = vmul.f32 %v1191_v40, %v1191_v40 }
 0x297   : > { %v975_v22 = vpop.f32.mrb[4].mxu1 }
 0x298   : > { %v982_v25 = vmul.f32 0.0625, %v975_v22  ;;  %v1804_v26 = vpop.f32.mrb[5].mxu1 }
 0x299   : > { %v978_v29 = vpop.f32.mrb[6].mxu1 }
 0x29a   : > { %v1192_v34 = vmul.f32 0.05, %v982_v25  ;;  %1629 = vst.msk [vmem:[%s2576_s21 + $0x10] sm:$0xff] %vm1231_vm2, %v982_v25  ;;  %v983_v35 = vmul.f32 0.0625, %v978_v29  ;;  %v1805_v37 = vpop.f32.mrb[7].mxu1 }
 0x29c   : > { %v1197_v41 = vsub.f32 %v1192_v34, %v1627_v28  ;;  %v1193_v42 = vmul.f32 0.05, %v983_v35  ;;  %1630 = vst.msk [vmem:[%s2576_s21 + $0x18] sm:$0xff] %vm1231_vm2, %v983_v35 }
 0x29e   : > { %v1201_v44 = vmul.f32 %v1197_v41, %v1197_v41  ;;  %v1198_v45 = vsub.f32 %v1193_v42, %v1628_v38 }
 0x2a0   : > { %v1203_v47 = vadd.f32 %v1201_v44, %v1199_v36  ;;  %v1202_v48 = vmul.f32 %v1198_v45, %v1198_v45 }
 0x2a2   : > { %1993 = vrsqrt.f32 %v1203_v47  ;;  %v1204_v49 = vadd.f32 %v1202_v48, %v1200_v46  ;;  %vm1207_vm3 = vcmp.eq.f32.partialorder %v1203_v47, inf  ;;  %v1210_v59 = vand.u32 2147483648, %v1203_v47 }
 0x2a3   : > { %vm1209_vm4 = vcmp.eq.f32.partialorder %v1203_v47, 0.0 }
 0x2a4   : > { %1995 = vrsqrt.f32 %v1204_v49  ;;  %vm1214_vm5 = vcmp.eq.f32.partialorder %v1204_v49, inf  ;;  %v1217_v0 = vand.u32 2147483648, %v1204_v49  ;;  %vm1216_vm6 = vcmp.eq.f32.partialorder %v1204_v49, 0.0 }
 0x2ac   : > { %v1994_v52 = vpop.eup %1993 }
 0x2ad   : > { %v1206_v55 = vmul.f32 %v1994_v52, %v1203_v47 }
 0x2ae   : > { %v1996_v56 = vpop.eup %1995 }
 0x2af   : > { %v1208_v60 = vsel %vm1207_vm3, %v1203_v47, %v1206_v55  ;;  %v1213_v61 = vmul.f32 %v1996_v56, %v1204_v49 }
 0x2b0   : > { %v1211_v63 = vsel %vm1209_vm4, %v1210_v59, %v1208_v60 }
 0x2b1   : > { %v1215_v1 = vsel %vm1214_vm5, %v1204_v49, %v1213_v61  ;;  %v1219_v2 = vadd.f32 0.01, %v1211_v63 }
 0x2b2   : > { %v1218_v5 = vsel %vm1216_vm6, %v1217_v0, %v1215_v1 }
 0x2b3   : > { %v1220_v6 = vadd.f32 0.01, %v1218_v5  ;;  %1997 = vlog2.f32 %v1219_v2 }
 0x2b5   : > { %1999 = vlog2.f32 %v1220_v6 }
 0x2b7   : > { %v1177_v30 = vpop.f32.mrb[8].mxu1 }
 0x2b8   : > { %v1184_v9 = vmul.f32 0.0625, %v1177_v30  ;;  %v1852_v11 = vpop.f32.mrb[9].mxu1 }
 0x2b9   : > { %v1180_v12 = vpop.f32.mrb[10].mxu1 }
 0x2ba   : > { %v1272_v4 = vsub.f32 1.0, %v1184_v9  ;;  %1299 = vst.msk [vmem:[%s2578_s14] sm:$0xff] %vm1231_vm2, %v1184_v9  ;;  %v1185_v15 = vmul.f32 0.0625, %v1180_v12  ;;  %v1853_v17 = vpop.f32.mrb[11].mxu1  ;;  %v1270_v19 = vmul.f32 %v1268_v10, %v1184_v9 }
 0x2bc   : > { %v1273_v20 = vsub.f32 1.0, %v1185_v15  ;;  %1300 = vst.msk [vmem:[%s2578_s14 + $0x8] sm:$0xff] %vm1231_vm2, %v1185_v15  ;;  %v1276_v13 = vmul.f32 %v1274_v31, %v1272_v4  ;;  %v1271_v14 = vmul.f32 %v1269_v16, %v1185_v15  ;;  %s2099_s14 = sshll.u32 %s2283_s1, 4  ;;  %s2100_s14 = int_to_ptr.vmem [resolvable:$false] %s2099_s14 }
 0x2bd   : > { %v1998_v21 = vpop.eup %1997  ;;  %s2101_s19 = scalar_lea.vmem %s2100_s14, 512  ;;  %p2102_p10 = scmp.lt.s32.totalorder %s2782_s23, %s2100_s14 }
 0x2be   : > { %v1222_v22 = vmul.f32 0.6931472, %v1998_v21  ;;  %v1277_v23 = vmul.f32 %v1275_v18, %v1273_v20  ;;  %v1278_v24 = vadd.f32 %v1276_v13, %v1270_v19  ;;  %p2103_p13 = scmp.lt.s32.totalorder %s2101_s19, %s2095_s24 }
 0x2bf   : > { %v2000_v25 = vpop.eup %1999 }
 0x2c0   : > { %v1224_v26 = vmul.f32 0.6931472, %v2000_v25  ;;  %v1225_v27 = vmul.f32 0.4, %v1222_v22  ;;  %v1279_v28 = vadd.f32 %v1277_v23, %v1271_v14  ;;  %v1280_v33 = vsel %vm1231_vm2, %v1278_v24, 0.0  ;;  %p2104_p9 = por %p2103_p13, %p2102_p10 }
 0x2c2   : > { %v1226_v29 = vmul.f32 0.4, %v1224_v26  ;;  %v1227_v32 = vmul.f32 1.442695, %v1225_v27  ;;  %v1281_v34 = vsel %vm1231_vm2, %v1279_v28, 0.0  ;;  %p2105_p4 = pnand %p2104_p9, %p2098_p12 }
 0x2c3   : > { %v1282_v35 = vadd.f32 %v1281_v34, %v1280_v33 }
 0x2c4   : > { %2001 = vpow2.f32 %v1227_v32  ;;  %v1229_v37 = vmul.f32 1.442695, %v1226_v29 }
 0x2c6   : > { %2003 = vpow2.f32 %v1229_v37 }
 0x2ce   : > { %v2002_v38 = vpop.eup %2001 }
 0x2cf   : > { %v1232_v40 = vsel %vm1231_vm2, %v2002_v38, 0.0 }
 0x2d0   : > { %v2004_v39 = vpop.eup %2003 }
 0x2d1   : > { %v1233_v41 = vsel %vm1231_vm2, %v2004_v39, 0.0 }
 0x2d2   : > { %v1234_v42 = vadd.f32 %v1233_v41, %v1232_v40 }
 0x2d4   : > { %1235 = vadd.xlane.f32.xlu0 %v1234_v42 }
 0x2d8   : > { %1283 = vadd.xlane.f32.xlu0 %v1282_v35 }
 0x2d9   : > { %2108 = shalt.err (!%p2105_p4)
}
 0x2da   : > { %s2109_s26 = scalar_lea.hbm %s2780_s29, 256  ;;  %s2113_s9 = scalar_lea.hbm %s2925_s7, 512 }
 0x2db   : > { %p2110_p3 = scmp.ne.s32.totalorder %s2780_s29, %s2109_s26  ;;  %p2114_p1 = scmp.lt.u32.totalorder %s2780_s29, %s2925_s7 }
 0x2dc   : > { %p2115_p0 = scmp.lt.u32.totalorder %s2113_s9, %s2109_s26  ;;  %p2117_p6 = scmp.lt.u32.totalorder %s2109_s26, %s2780_s29 }
 0x2dd   : > { %p2111_p5 = pnand %p2110_p3, %p2965_p8 }
 0x2de   : > { %p2116_p7 = por %p2115_p0, %p2114_p1 }
 0x2df   : > { %p2112_p2 = pneg %p2111_p5 }
 0x2e0   : > { %p2118_p11 = por %p2117_p6, %p2116_p7 }
 0x2e2   : > { %p2119_p12 = pnand %p2118_p11, %p2112_p2 }
 0x2e4   : > { %2122 = shalt.err (!%p2119_p12)
}
 0x2e5   : > { %s2284_s27 = smov 128   ;;  %s2285_s25 = smov 8  }
 0x2e6   : > { %1889 = dma.vmem_to_hbm [thread:$0]  (%p2965_p8), %s2782_s23, 256, %s2780_s29, %s2786_s28, %s2284_s27, %s2284_s27, %s2285_s25  }
 0x2e7   : > { %s1648_s20 = sshll.u32 %s2265_s12, 9  ;;  %s1330_s17 = sshll.u32 %s2576_s21, 4  ;;  %s2820_s17 = int_to_ptr.vmem [resolvable:$true] %s1330_s17 }
 0x2e8   : > { %s2818_s14 = scalar_lea.hbm %s2924_s6, %s1648_s20  ;;  %s1310_s19 = scalar_lea.sflag [#allocation4], %s2544_s0 }
 0x2e9   : > { %s2123_s26 = scalar_lea.vmem %s2820_s17, 512  ;;  %s2286_s18 = smov [#allocation8]  }
 0x2ea   : > { %p2124_p10 = scmp.ne.s32.totalorder %s2820_s17, %s2123_s26  ;;  %s2127_s23 = sshll.u32 %s2286_s18, 4  ;;  %s2128_s23 = int_to_ptr.vmem [resolvable:$false] %s2127_s23 }
 0x2eb   : > { %s2129_s12 = scalar_lea.vmem %s2128_s23, 1024  ;;  %p2130_p4 = scmp.lt.s32.totalorder %s2820_s17, %s2128_s23 }
 0x2ec   : > { %p2125_p13 = pnand %p2124_p10, %p2965_p8  ;;  %p2131_p3 = scmp.lt.s32.totalorder %s2129_s12, %s2123_s26 }
 0x2ee   : > { %p2126_p9 = pneg %p2125_p13  ;;  %p2132_p5 = por %p2131_p3, %p2130_p4 }
 0x2f0   : > { %p2133_p2 = pnand %p2132_p5, %p2126_p9 }
 0x2f2   : > { %2136 = shalt.err (!%p2133_p2)
}
 0x2f3   : > { %s2137_s21 = scalar_lea.hbm %s2818_s14, 512  ;;  %s2141_s16 = scalar_lea.hbm %s2924_s6, 1024 }
 0x2f4   : > { %p2138_p1 = scmp.ne.s32.totalorder %s2818_s14, %s2137_s21  ;;  %p2142_p6 = scmp.lt.u32.totalorder %s2818_s14, %s2924_s6 }
 0x2f5   : > { %p2143_p11 = scmp.lt.u32.totalorder %s2141_s16, %s2137_s21  ;;  %p2145_p10 = scmp.lt.u32.totalorder %s2137_s21, %s2818_s14 }
 0x2f6   : > { %p2139_p0 = pnand %p2138_p1, %p2965_p8 }
 0x2f7   : > { %p2144_p12 = por %p2143_p11, %p2142_p6 }
 0x2f8   : > { %p2140_p7 = pneg %p2139_p0 }
 0x2f9   : > { %p2146_p13 = por %p2145_p10, %p2144_p12 }
 0x2fb   : > { %p2147_p9 = pnand %p2146_p13, %p2140_p7 }
 0x2fd   : > { %2150 = shalt.err (!%p2147_p9)
}
 0x2fe   : > { %1888 = dma.vmem_to_hbm [thread:$0]  (%p2965_p8), %s2820_s17, 512, %s2818_s14, %s1310_s19, %s2284_s27, %s2284_s27, %s2285_s25   ;;  %v1301_v56 = vld [vmem:[#allocation11] sm:$0x1]  ;;  %v1305_v59 = vld [vmem:[#allocation12] sm:$0x1] }
 0x2ff   : > { %s2287_s30 = smov [#allocation11]   ;;  %s2288_s17 = smov [#allocation12]  }
 0x300   : > { %s1362_s27 = sshll.u32 %s2287_s30, 4  ;;  %s1373_s24 = sshll.u32 %s2288_s17, 4  ;;  %s1363_s27 = int_to_ptr.vmem [resolvable:$true] %s1362_s27  ;;  %s1374_s24 = int_to_ptr.vmem [resolvable:$true] %s1373_s24 }
 0x301   : > { %s2151_s1 = scalar_lea.vmem %s1363_s27, 16  ;;  %p2966_p4 = scmp.eq.s32.totalorder %s2370_s15, 1 }
 0x302   : > { %p2152_p8 = scmp.ne.s32.totalorder %s1363_s27, %s2151_s1  ;;  %s2157_s14 = scalar_lea.vmem %s1363_s27, 32 }
 0x303   : > { %p2158_p2 = scmp.lt.s32.totalorder %s1363_s27, %s1363_s27  ;;  %p2159_p1 = scmp.lt.s32.totalorder %s2157_s14, %s2151_s1 }
 0x304   : > { %p2153_p3 = pnand %p2152_p8, %p2966_p4 }
 0x305   : > { %p2160_p0 = por %p2159_p1, %p2158_p2 }
 0x306   : > { %p2154_p5 = pneg %p2153_p3 }
 0x308   : > { %p2161_p7 = pnand %p2160_p0, %p2154_p5 }
 0x361   : > { %v1236_v43 = vpop.xlane.xlu0 %1235 }
 0x362   : > { %v1237_v36 = vrot.slane %v1236_v43, 4 }
 0x364   : > { %v1238_v44 = vadd.f32 %v1237_v36, %v1236_v43 }
 0x365   : > { %v1284_v45 = vpop.xlane.xlu0 %1283 }
 0x366   : > { %v1239_v46 = vrot.slane %v1238_v44, 2  ;;  %v1285_v47 = vrot.slane %v1284_v45, 4 }
 0x368   : > { %v1286_v48 = vadd.f32 %v1285_v47, %v1284_v45  ;;  %v1240_v49 = vadd.f32 %v1239_v46, %v1238_v44 }
 0x36a   : > { %v1287_v50 = vrot.slane %v1286_v48, 2  ;;  %v1241_v51 = vrot.slane %v1240_v49, 1 }
 0x36c   : > { %v1288_v52 = vadd.f32 %v1287_v50, %v1286_v48  ;;  %v1242_v53 = vadd.f32 %v1241_v51, %v1240_v49 }
 0x36e   : > { %1878 = vpush %v1242_v53  ;;  %v1289_v54 = vrot.slane %v1288_v52, 1 }
 0x370   : > { %v1290_v55 = vadd.f32 %v1289_v54, %v1288_v52 }
 0x372   : > { %1880 = vpush %v1290_v55 }
 0x39f   : > { %s1879_s22 = spop %1878 }
 0x3a0   : > { %s1244_s0 = smul.f32 0.16, %s1879_s22 }
 0x3a2   : > { %v1302_v57 = vstv %s1244_s0 }
 0x3a3   : > { %v1303_v58 = vadd.f32 %v1302_v57, %v1301_v56  ;;  %s1881_s25 = spop %1880 }
 0x3a4   : > { %s1292_s20 = smul.f32 0.16, %s1881_s25 }
 0x3a5   : > { %1304 = vst [vmem:[#allocation11] sm:$0x1] %v1303_v58 }
 0x3a6   : > { %v1306_v60 = vstv %s1292_s20 }
 0x3a7   : > { %2164 = shalt.err (!%p2161_p7)
}
 0x3a8   : > { %s2165_s18 = scalar_lea.hbm %s2926_s8, 16  ;;  %p2967_p11 = pmov %p2966_p4 }
 0x3a9   : > { %p2166_p6 = scmp.ne.s32.totalorder %s2926_s8, %s2165_s18  ;;  %p2171_p13 = scmp.lt.u32.totalorder %s2165_s18, %s2926_s8 }
 0x3ab   : > { %p2167_p12 = pnand %p2166_p6, %p2967_p11 }
 0x3ad   : > { %p2168_p10 = pneg %p2167_p12 }
 0x3af   : > { %p2173_p9 = pnand %p2171_p13, %p2168_p10 }
 0x3b1   : > { %2176 = shalt.err (!%p2173_p9)
}
 0x3b2   : > { %p2968_p8 = pmov %p2966_p4  ;;  %v1307_v61 = vadd.f32 %v1306_v60, %v1305_v59  ;;  %s2177_s9 = scalar_lea.vmem %s1374_s24, 16 }
 0x3b3   : > { %p2178_p4 = scmp.ne.s32.totalorder %s1374_s24, %s2177_s9  ;;  %s2183_s11 = scalar_lea.vmem %s1374_s24, 32 }
 0x3b4   : > { %1891 = dma.vmem_to_hbm [thread:$0]  (%p2968_p8), %s1363_s27, 16, %s2926_s8, [#allocation10]   ;;  %1308 = vst [vmem:[#allocation12] sm:$0x1] %v1307_v61 }
 0x3b5   : > { %p2969_p3 = pmov %p2968_p8  ;;  %p2184_p1 = scmp.lt.s32.totalorder %s1374_s24, %s1374_s24 }
 0x3b6   : > { %p2185_p0 = scmp.lt.s32.totalorder %s2183_s11, %s2177_s9 }
 0x3b7   : > { %p2179_p5 = pnand %p2178_p4, %p2969_p3 }
 0x3b8   : > { %p2186_p7 = por %p2185_p0, %p2184_p1 }
 0x3b9   : > { %p2180_p2 = pneg %p2179_p5 }
 0x3bb   : > { %p2187_p6 = pnand %p2186_p7, %p2180_p2 }
 0x3bd   : > { %2190 = shalt.err (!%p2187_p6)
}
 0x3be   : > { %s2970_s30 = sld [smem:[#allocation28_spill]]  ;;  %p2972_p12 = pmov %p2969_p3 }
 0x3c4   : > { %s2971_s25 = smov %s2970_s30  ;;  %s2191_s20 = scalar_lea.hbm %s2970_s30, 16 }
 0x3c5   : > { %p2192_p11 = scmp.ne.s32.totalorder %s2971_s25, %s2191_s20  ;;  %p2197_p9 = scmp.lt.u32.totalorder %s2191_s20, %s2971_s25 }
 0x3c7   : > { %p2193_p10 = pnand %p2192_p11, %p2972_p12 }
 0x3c9   : > { %p2194_p13 = pneg %p2193_p10 }
 0x3cb   : > { %p2199_p8 = pnand %p2197_p9, %p2194_p13 }
 0x3cd   : > { %2202 = shalt.err (!%p2199_p8)
}
 0x3ce   : > { %p2973_p4 = pmov %p2969_p3 }
 0x3d0   : > { %1893 = dma.vmem_to_hbm [thread:$0]  (%p2973_p4), %s1374_s24, 16, %s2971_s25, [#allocation13]  }
 0x3d1   : > { %2236 = dma.done.wait (%p2969_p3), [#allocation10], 16   ;;  %p2974_p5 = pmov %p2969_p3 }
 0x3d2   : > { %p2975_p2 = pmov %p2969_p3 }
 0x3d3   : > { %2238 = vsyncadd (%p2974_p5), [#allocation10], 4294967280 }
 0x3d4   : > { %2240 = dma.done.wait (%p2975_p2), [#allocation13], 16   ;;  %p2976_p1 = pmov %p2975_p2 }
 0x3d6   : > { %2242 = vsyncadd (%p2976_p1), [#allocation13], 4294967280 }
 0x3d7 PF: > { %s2977_s18 = sld [smem:[#allocation20_spill]]  ;;  %s2978_s23 = sld [smem:[#allocation25_spill]] }
 0x3d8   : > { %s2979_s12 = sld [smem:[#allocation22_spill]] }
 0x3dd   : > { %s1393_s21 = sand.u32 1, %s2977_s18   ;;  %p2980_p0 = scmp.ne.s32.totalorder %s2978_s23, 0 }
 0x3de   : > { %p2981_p7 = scmp.ge.s32.totalorder %s2979_s12, 2  ;;  %s1394_s24 = scalar_lea.sflag [#allocation4], %s1393_s21 }
 0x3e0   : > { %p1911_p6 = pnand %p2981_p7, %p2980_p0 }
 0x3e2   : > { %2244 = dma.done.wait (!%p1911_p6), %s1394_s24, 512  }
 0x3e3   : > { %2246 = vsyncadd (!%p1911_p6), %s1394_s24, 4294966784  ;;  %s2982_s29 = sadd.s32 4294967294, %s2979_s12  }
 0x3e4   : > { %s1402_s28 = sand.u32 1, %s2982_s29  }
 0x3e5   : > { %s1403_s16 = scalar_lea.sflag [#allocation10], %s1402_s28 }
 0x3e6   : > { %2248 = dma.done.wait (!%p1911_p6), %s1403_s16, 256  }
 0x3e7   : > { %2250 = vsyncadd (!%p1911_p6), %s1403_s16, 4294967040  ;;  %s33_s14 = sadd.s32 1, %s2979_s12   ;;  %s2983_s15 = sld [smem:[#allocation21_spill]] }
 0x3e8   : > { %p30_p11 = scmp.ge.s32.totalorder %s33_s14, 4   ;;  %s2984_s11 = sld [smem:[#allocation24_spill]] }
 0x3e9   : > { %s2985_s9 = sld [smem:[#allocation23_spill]]  ;;  %s2986_s30 = smov %s2257_s10 }
 0x3ea   : > { %s2988_s12 = smov %s2269_s13  ;;  %32 = sbr.rel (!%p30_p11) target bundleno = 15 (0xf), region = 156 }
 0x3ed   : > { %s2987_s10 = smov %s2983_s15 }
 0x3ef   : > { %s2989_s13 = smov %s2985_s9 }
 0x3f1   :  { %1408 = vsyncpa [#allocation3], 1 }
 0x3f2   :  { %1410 = vsyncpa [#allocation3 + $0x1], 1 }
 0x3f3   :  { %1411 = vsyncpa [#allocation6], 1 }
 0x3f4   :  { %1413 = vsyncpa [#allocation6 + $0x1], 1 }
 0x3f5   :  { %1414 = vsyncpa [#allocation4], 1 }
 0x3f6   :  { %1416 = vsyncpa [#allocation4 + $0x1], 1 }
 0x3f7   :  { %1417 = vsyncpa [#allocation10], 1 }
 0x3f8   :  { %1419 = vsyncpa [#allocation10 + $0x1], 1 }
 0x3f9   :  { %1420 = vsyncpa [#allocation13], 1 }

</bundles_post_ra>
